<compile_context>
chip_gen: v7x
topology: tpu7x:2x2x1
jax: 0.10.0
libtpu: 0.0.40
codegen_flags: <defaults>
</compile_context>

<pallas_src>
import jax
import jax.numpy as jnp
from jax import lax
from jax.experimental import pallas as pl
from jax.experimental.pallas import tpu as pltpu


_MM_DTYPE = jnp.bfloat16      # MXU operand dtype (accumulation stays f32)
_NEG_INF = -1e30              # additive mask for off-block (cross-batch) scores
_LANE = 128                   # lane-dense output padding


# ----------------------------------------------------------------------------
# Fused forward kernel (one batch tile per grid step, everything in VMEM/vregs)
# ----------------------------------------------------------------------------
def _fused_kernel(a_ref, b_ref, mask_ab_ref, mask_ba_ref, sum_a_ref, sum_b_ref,
                  f_w1_ref, f_b1_ref, f_w2_ref, f_b2_ref,
                  g_w1a_ref, g_w1b_ref, g_b1_ref, g_w2_ref, g_b2_ref,
                  h_w1a_ref, h_w1b_ref, h_b1_ref, h_w2_ref, h_b2_ref,
                  o_w_ref, o_b_ref,
                  y_ref):
    f32 = jnp.float32
    mm = _MM_DTYPE

    a2 = a_ref[...]                     # (bt*sa, emb)  bf16, pre-flattened in wrapper
    b2 = b_ref[...]                     # (bt*sb, emb)  bf16

    # ---- Attend: f MLP on both sides (flattened 2-D matmuls) ----
    def mlp_f(x2):
        t = jnp.dot(x2, f_w1_ref[...], preferred_element_type=f32) + f_b1_ref[...]
        t = jnp.maximum(t, 0.0)
        t = jnp.dot(t.astype(mm), f_w2_ref[...], preferred_element_type=f32) + f_b2_ref[...]
        return jnp.maximum(t, 0.0)

    f_a = mlp_f(a2)                     # (bt*sa, hid)  f32
    f_b = mlp_f(b2)                     # (bt*sb, hid)  f32

    # Flattened, block-masked attention scores: ONE big MXU matmul instead of a
    # loop of tiny per-batch vmatmuls.  Transposed scores recomputed on the MXU
    # (no XLU transpose); both softmaxes are lane-dim reductions.
    nt = (((1,), (1,)), ((), ()))       # contract last dims: X @ Y^T without .T
    scores = lax.dot_general(f_a.astype(mm), f_b.astype(mm), nt,
                             preferred_element_type=f32) + mask_ab_ref[...]
    scores_t = lax.dot_general(f_b.astype(mm), f_a.astype(mm), nt,
                               preferred_element_type=f32) + mask_ba_ref[...]

    def softmax_last(x):                # f32 elementwise (v5e VPU/EUP lack bf16)
        m = jnp.max(x, axis=-1, keepdims=True)
        p = jnp.exp(x - m)
        return p * pl.reciprocal(jnp.sum(p, axis=-1, keepdims=True), approx=True)

    beta = jnp.dot(softmax_last(scores).astype(mm), b2,
                   preferred_element_type=f32)              # (bt*sa, emb)
    alpha = jnp.dot(softmax_last(scores_t).astype(mm), a2,
                    preferred_element_type=f32)             # (bt*sb, emb)

    # ---- Compare: g MLP on [X, attn] (concat folded into split weights) ----
    def mlp_g(x2, attn):
        t = (jnp.dot(x2, g_w1a_ref[...], preferred_element_type=f32)
             + jnp.dot(attn.astype(mm), g_w1b_ref[...], preferred_element_type=f32)
             + g_b1_ref[...])
        t = jnp.maximum(t, 0.0)
        t = jnp.dot(t.astype(mm), g_w2_ref[...], preferred_element_type=f32) + g_b2_ref[...]
        return jnp.maximum(t, 0.0)

    v_a = mlp_g(a2, beta)               # (bt*sa, hid)  f32
    v_b = mlp_g(b2, alpha)              # (bt*sb, hid)  f32

    # ---- Aggregate: seq-sum via hoisted constant block-ones matmul (MXU) ----
    va = jnp.dot(sum_a_ref[...], v_a.astype(mm), preferred_element_type=f32)   # (bt, hid)
    vb = jnp.dot(sum_b_ref[...], v_b.astype(mm), preferred_element_type=f32)   # (bt, hid)

    t = (jnp.dot(va.astype(mm), h_w1a_ref[...], preferred_element_type=f32)
         + jnp.dot(vb.astype(mm), h_w1b_ref[...], preferred_element_type=f32)
         + h_b1_ref[...])
    t = jnp.maximum(t, 0.0)
    t = jnp.dot(t.astype(mm), h_w2_ref[...], preferred_element_type=f32) + h_b2_ref[...]
    t = jnp.maximum(t, 0.0)
    # lane-dense (bt, 128) store (padded final Linear); wrapper slices [:, :3]
    y_ref[...] = (jnp.dot(t.astype(mm), o_w_ref[...], preferred_element_type=f32)
                  + o_b_ref[...])


_WEIGHT_ORDER = ("f_w1", "f_b1", "f_w2", "f_b2",
                 "g_w1a", "g_w1b", "g_b1", "g_w2", "g_b2",
                 "h_w1a", "h_w1b", "h_b1", "h_w2", "h_b2",
                 "o_w", "o_b")
_MATMUL_WEIGHTS = frozenset(("f_w1", "f_w2", "g_w1a", "g_w1b", "g_w2",
                             "h_w1a", "h_w1b", "h_w2"))


def _full_spec(arr):
    nd = arr.ndim
    return pl.BlockSpec(arr.shape, lambda i, _nd=nd: (0,) * _nd)


def _pick_bt(bn, sa):
    """Batch tile: aim for ~256 flattened rows (fills MXU M dim on v6e/v7x,
    >=128 for v5e); at small batches use one full-batch tile (grid=(1,))."""
    target_rows = 256
    if bn * sa <= target_rows:
        return bn
    for bt in range(bn - 1, 0, -1):
        if bn % bt == 0 and bt % 8 == 0 and bt * sa <= target_rows:
            return bt
    return bn


def _vmem_limit_bytes():
    # Generation-aware scoped VMEM: ~3/4 of physical, capped at 96 MiB
    # (v5e/v6e: 128 MiB physical -> 96 MiB; v7x: 64 MiB physical -> 48 MiB).
    try:
        cap = pltpu.get_tpu_info().vmem_capacity_bytes
    except Exception:
        cap = 64 * 1024 * 1024
    return int(min(cap * 3 // 4, 96 * 1024 * 1024))


@jax.jit
def decomposable_attention_forward(params, premise, hypothesis):
    p = params
    bn, sa, emb = premise.shape
    sb = hypothesis.shape[1]
    n_out = p["o_w"].shape[1]
    n_out_pad = ((n_out + _LANE - 1) // _LANE) * _LANE

    bt = _pick_bt(bn, sa)
    grid = (bn // bt,)

    # Wrapper-side flatten + bf16 cast (free XLA ops; no in-kernel relayout).
    a2 = premise.reshape(bn * sa, emb).astype(_MM_DTYPE)
    b2 = hypothesis.reshape(bn * sb, emb).astype(_MM_DTYPE)

    # Hoisted compile-time constants (per batch tile): block-diagonal softmax
    # bias for the flattened scores and block-ones seq-sum matrices.
    rows_a = jnp.arange(bt * sa) // sa
    rows_b = jnp.arange(bt * sb) // sb
    same = rows_a[:, None] == rows_b[None, :]
    mask_ab = jnp.where(same, 0.0, _NEG_INF).astype(jnp.float32)       # (bt*sa, bt*sb)
    mask_ba = jnp.where(same.T, 0.0, _NEG_INF).astype(jnp.float32)     # (bt*sb, bt*sa)
    sum_a = (jnp.arange(bt)[:, None] == rows_a[None, :]).astype(_MM_DTYPE)   # (bt, bt*sa)
    sum_b = (jnp.arange(bt)[:, None] == rows_b[None, :]).astype(_MM_DTYPE)   # (bt, bt*sb)
    consts = [mask_ab, mask_ba, sum_a, sum_b]

    # Weights: MXU operands in bf16, biases f32; final Linear lane-padded.
    o_w = jnp.pad(p["o_w"], ((0, 0), (0, n_out_pad - n_out))).astype(_MM_DTYPE)
    o_b = jnp.pad(p["o_b"], ((0, 0), (0, n_out_pad - n_out))).astype(jnp.float32)

    def cast_w(name):
        arr = p[name]
        return arr.astype(_MM_DTYPE) if name in _MATMUL_WEIGHTS else arr.astype(jnp.float32)

    weights = [cast_w(k) for k in _WEIGHT_ORDER[:-2]] + [o_w, o_b]

    in_specs = ([pl.BlockSpec((bt * sa, emb), lambda i: (i, 0)),
                 pl.BlockSpec((bt * sb, emb), lambda i: (i, 0))]
                + [_full_spec(c) for c in consts]
                + [_full_spec(w) for w in weights])

    out = pl.pallas_call(
        _fused_kernel,
        grid=grid,
        in_specs=in_specs,
        out_specs=pl.BlockSpec((bt, n_out_pad), lambda i: (i, 0)),
        out_shape=jax.ShapeDtypeStruct((bn, n_out_pad), jnp.float32),
        compiler_params=pltpu.CompilerParams(
            dimension_semantics=("parallel",),   # shard batch tiles across TCs (v7x)
            vmem_limit_bytes=_vmem_limit_bytes(),
        ),
    )(a2, b2, *consts, *weights)
    return out[:, :n_out]


# ----------------------------------------------------------------------------
# Parameter construction (deterministic, synthetic). First-layer weights of
# the "cat" MLPs are stored split so the concat folds into two matmuls.
# ----------------------------------------------------------------------------
def make_params(key, embed_size, num_hiddens, num_outputs=3):
    def lin(k, din, dout, scale=0.05):
        kw, kb = jax.random.split(k)
        w = scale * jax.random.normal(kw, (din, dout), jnp.float32)
        b = scale * jax.random.normal(kb, (1, dout), jnp.float32)
        return w, b

    ks = jax.random.split(key, 7)
    p = {}
    # Attend.f : embed -> H -> H
    p["f_w1"], p["f_b1"] = lin(ks[0], embed_size, num_hiddens)
    p["f_w2"], p["f_b2"] = lin(ks[1], num_hiddens, num_hiddens)
    # Compare.g : 2*embed -> H -> H   (first layer split for in-kernel concat)
    g_w1, p["g_b1"] = lin(ks[2], 2 * embed_size, num_hiddens)
    p["g_w1a"] = g_w1[:embed_size]
    p["g_w1b"] = g_w1[embed_size:]
    p["g_w2"], p["g_b2"] = lin(ks[3], num_hiddens, num_hiddens)
    # Aggregate.h : 2*H -> H -> H     (first layer split for in-kernel concat)
    h_w1, p["h_b1"] = lin(ks[4], 2 * num_hiddens, num_hiddens)
    p["h_w1a"] = h_w1[:num_hiddens]
    p["h_w1b"] = h_w1[num_hiddens:]
    p["h_w2"], p["h_b2"] = lin(ks[5], num_hiddens, num_hiddens)
    # Aggregate.linear : H -> 3
    p["o_w"], p["o_b"] = lin(ks[6], num_hiddens, num_outputs)
    return p


# ----------------------------------------------------------------------------
# Pure-JAX f32 reference (numerical sanity check)
# ----------------------------------------------------------------------------
def reference_forward(p, a, b):
    def mlp(x, w1, b1, w2, b2):
        x = jnp.maximum(x @ w1 + b1, 0.0)
        return jnp.maximum(x @ w2 + b2, 0.0)

    f_a = mlp(a, p["f_w1"], p["f_b1"], p["f_w2"], p["f_b2"])
    f_b = mlp(b, p["f_w1"], p["f_b1"], p["f_w2"], p["f_b2"])
    e = jnp.einsum("bqh,bkh->bqk", f_a, f_b)
    beta = jnp.einsum("bqk,bke->bqe", jax.nn.softmax(e, axis=-1), b)
    alpha = jnp.einsum("bkq,bqe->bke",
                       jax.nn.softmax(jnp.swapaxes(e, 1, 2), axis=-1), a)
    g_w1 = jnp.concatenate([p["g_w1a"], p["g_w1b"]], axis=0)
    v_a = mlp(jnp.concatenate([a, beta], axis=2),
              g_w1, p["g_b1"], p["g_w2"], p["g_b2"])
    v_b = mlp(jnp.concatenate([b, alpha], axis=2),
              g_w1, p["g_b1"], p["g_w2"], p["g_b2"])
    x = jnp.concatenate([v_a.sum(axis=1), v_b.sum(axis=1)], axis=1)
    h_w1 = jnp.concatenate([p["h_w1a"], p["h_w1b"]], axis=0)
    x = mlp(x, h_w1, p["h_b1"], p["h_w2"], p["h_b2"])
    return x @ p["o_w"] + p["o_b"]


if __name__ == "__main__":
    batch, seq, embed_size, num_hiddens = 16, 8, 32, 64

    key = jax.random.PRNGKey(0)
    k_prem, k_hyp, k_par = jax.random.split(key, 3)
    premise = jax.random.normal(k_prem, (batch, seq, embed_size), jnp.float32)
    hypothesis = jax.random.normal(k_hyp, (batch, seq, embed_size), jnp.float32)
    params = make_params(k_par, embed_size, num_hiddens, num_outputs=3)

    y = decomposable_attention_forward(params, premise, hypothesis)
    y = jax.block_until_ready(y)

    y_ref = reference_forward(params, premise, hypothesis)
    assert y.shape == (batch, 3)
    # Loosened tolerance: bf16 MXU operands (f32 accumulation) plus the EUP
    # approximate reciprocal in the softmax normalization.
    assert jnp.allclose(y, y_ref, atol=2e-2, rtol=2e-2), (y, y_ref)

    print("KERNEL_OK")
</pallas_src>

<mosaic_0001>
module attributes {stable_mosaic.version = 11 : i64} {
  func.func @_fused_kernel(%arg0: i32, %arg1: memref<128x32xbf16, #tpu.memory_space<vmem>>, %arg2: memref<128x32xbf16, #tpu.memory_space<vmem>>, %arg3: memref<128x128xf32, #tpu.memory_space<vmem>>, %arg4: memref<128x128xf32, #tpu.memory_space<vmem>>, %arg5: memref<16x128xbf16, #tpu.memory_space<vmem>>, %arg6: memref<16x128xbf16, #tpu.memory_space<vmem>>, %arg7: memref<32x64xbf16, #tpu.memory_space<vmem>>, %arg8: memref<1x64xf32, #tpu.memory_space<vmem>>, %arg9: memref<64x64xbf16, #tpu.memory_space<vmem>>, %arg10: memref<1x64xf32, #tpu.memory_space<vmem>>, %arg11: memref<32x64xbf16, #tpu.memory_space<vmem>>, %arg12: memref<32x64xbf16, #tpu.memory_space<vmem>>, %arg13: memref<1x64xf32, #tpu.memory_space<vmem>>, %arg14: memref<64x64xbf16, #tpu.memory_space<vmem>>, %arg15: memref<1x64xf32, #tpu.memory_space<vmem>>, %arg16: memref<64x64xbf16, #tpu.memory_space<vmem>>, %arg17: memref<64x64xbf16, #tpu.memory_space<vmem>>, %arg18: memref<1x64xf32, #tpu.memory_space<vmem>>, %arg19: memref<64x64xbf16, #tpu.memory_space<vmem>>, %arg20: memref<1x64xf32, #tpu.memory_space<vmem>>, %arg21: memref<64x128xbf16, #tpu.memory_space<vmem>>, %arg22: memref<1x128xf32, #tpu.memory_space<vmem>>, %arg23: memref<16x128xf32, #tpu.memory_space<vmem>>) attributes {dimension_semantics = [#tpu.dimension_semantics<parallel>], iteration_bounds = array<i64: 1>, scalar_prefetch = 0 : i64, scratch_operands = 0 : i64, tpu.core_type = #tpu.core_type<tc>, window_params = [{transform_indices = @transform_0, window_bounds = array<i64: 128, 32>}, {transform_indices = @transform_1, window_bounds = array<i64: 128, 32>}, {pipeline_mode = #tpu.pipeline_mode<synchronous>, transform_indices = @transform_2, window_bounds = array<i64: 128, 128>}, {pipeline_mode = #tpu.pipeline_mode<synchronous>, transform_indices = @transform_3, window_bounds = array<i64: 128, 128>}, {pipeline_mode = #tpu.pipeline_mode<synchronous>, transform_indices = @transform_4, window_bounds = array<i64: 16, 128>}, {pipeline_mode = #tpu.pipeline_mode<synchronous>, transform_indices = @transform_5, window_bounds = array<i64: 16, 128>}, {pipeline_mode = #tpu.pipeline_mode<synchronous>, transform_indices = @transform_6, window_bounds = array<i64: 32, 64>}, {pipeline_mode = #tpu.pipeline_mode<synchronous>, transform_indices = @transform_7, window_bounds = array<i64: 1, 64>}, {pipeline_mode = #tpu.pipeline_mode<synchronous>, transform_indices = @transform_8, window_bounds = array<i64: 64, 64>}, {pipeline_mode = #tpu.pipeline_mode<synchronous>, transform_indices = @transform_9, window_bounds = array<i64: 1, 64>}, {pipeline_mode = #tpu.pipeline_mode<synchronous>, transform_indices = @transform_10, window_bounds = array<i64: 32, 64>}, {pipeline_mode = #tpu.pipeline_mode<synchronous>, transform_indices = @transform_11, window_bounds = array<i64: 32, 64>}, {pipeline_mode = #tpu.pipeline_mode<synchronous>, transform_indices = @transform_12, window_bounds = array<i64: 1, 64>}, {pipeline_mode = #tpu.pipeline_mode<synchronous>, transform_indices = @transform_13, window_bounds = array<i64: 64, 64>}, {pipeline_mode = #tpu.pipeline_mode<synchronous>, transform_indices = @transform_14, window_bounds = array<i64: 1, 64>}, {pipeline_mode = #tpu.pipeline_mode<synchronous>, transform_indices = @transform_15, window_bounds = array<i64: 64, 64>}, {pipeline_mode = #tpu.pipeline_mode<synchronous>, transform_indices = @transform_16, window_bounds = array<i64: 64, 64>}, {pipeline_mode = #tpu.pipeline_mode<synchronous>, transform_indices = @transform_17, window_bounds = array<i64: 1, 64>}, {pipeline_mode = #tpu.pipeline_mode<synchronous>, transform_indices = @transform_18, window_bounds = array<i64: 64, 64>}, {pipeline_mode = #tpu.pipeline_mode<synchronous>, transform_indices = @transform_19, window_bounds = array<i64: 1, 64>}, {pipeline_mode = #tpu.pipeline_mode<synchronous>, transform_indices = @transform_20, window_bounds = array<i64: 64, 128>}, {pipeline_mode = #tpu.pipeline_mode<synchronous>, transform_indices = @transform_21, window_bounds = array<i64: 1, 128>}, {transform_indices = @transform_22, window_bounds = array<i64: 16, 128>}]} {
    %c0 = arith.constant 0 : index
    %c0_0 = arith.constant 0 : index
    %0 = vector.load %arg1[%c0, %c0_0] : memref<128x32xbf16, #tpu.memory_space<vmem>>, vector<128x32xbf16>
    %c0_1 = arith.constant 0 : index
    %c0_2 = arith.constant 0 : index
    %1 = vector.load %arg2[%c0_1, %c0_2] : memref<128x32xbf16, #tpu.memory_space<vmem>>, vector<128x32xbf16>
    %c0_3 = arith.constant 0 : index
    %c0_4 = arith.constant 0 : index
    %2 = vector.load %arg7[%c0_3, %c0_4] : memref<32x64xbf16, #tpu.memory_space<vmem>>, vector<32x64xbf16>
    %cst = arith.constant dense<0.000000e+00> : vector<128x64xf32>
    %3 = tpu.matmul %0, %2, %cst {dimension_numbers = #tpu.dot_dimension_numbers<[1], [0], [0], [1], [0, 0, 1, 1], [], []>} : vector<128x32xbf16>, vector<32x64xbf16>, vector<128x64xf32> -> vector<128x64xf32>
    %c0_5 = arith.constant 0 : index
    %c0_6 = arith.constant 0 : index
    %4 = vector.load %arg8[%c0_5, %c0_6] : memref<1x64xf32, #tpu.memory_space<vmem>>, vector<1x64xf32>
    %5 = vector.broadcast %4 : vector<1x64xf32> to vector<128x64xf32>
    %6 = arith.addf %3, %5 : vector<128x64xf32>
    %cst_7 = arith.constant 0.000000e+00 : f32
    %7 = vector.broadcast %cst_7 : f32 to vector<128x64xf32>
    %8 = arith.maximumf %6, %7 : vector<128x64xf32>
    %9 = arith.truncf %8 : vector<128x64xf32> to vector<128x64xbf16>
    %c0_8 = arith.constant 0 : index
    %c0_9 = arith.constant 0 : index
    %10 = vector.load %arg9[%c0_8, %c0_9] : memref<64x64xbf16, #tpu.memory_space<vmem>>, vector<64x64xbf16>
    %cst_10 = arith.constant dense<0.000000e+00> : vector<128x64xf32>
    %11 = tpu.matmul %9, %10, %cst_10 {dimension_numbers = #tpu.dot_dimension_numbers<[1], [0], [0], [1], [0, 0, 1, 1], [], []>} : vector<128x64xbf16>, vector<64x64xbf16>, vector<128x64xf32> -> vector<128x64xf32>
    %c0_11 = arith.constant 0 : index
    %c0_12 = arith.constant 0 : index
    %12 = vector.load %arg10[%c0_11, %c0_12] : memref<1x64xf32, #tpu.memory_space<vmem>>, vector<1x64xf32>
    %13 = vector.broadcast %12 : vector<1x64xf32> to vector<128x64xf32>
    %14 = arith.addf %11, %13 : vector<128x64xf32>
    %cst_13 = arith.constant 0.000000e+00 : f32
    %15 = vector.broadcast %cst_13 : f32 to vector<128x64xf32>
    %16 = arith.maximumf %14, %15 : vector<128x64xf32>
    %c0_14 = arith.constant 0 : index
    %c0_15 = arith.constant 0 : index
    %17 = vector.load %arg7[%c0_14, %c0_15] : memref<32x64xbf16, #tpu.memory_space<vmem>>, vector<32x64xbf16>
    %cst_16 = arith.constant dense<0.000000e+00> : vector<128x64xf32>
    %18 = tpu.matmul %1, %17, %cst_16 {dimension_numbers = #tpu.dot_dimension_numbers<[1], [0], [0], [1], [0, 0, 1, 1], [], []>} : vector<128x32xbf16>, vector<32x64xbf16>, vector<128x64xf32> -> vector<128x64xf32>
    %c0_17 = arith.constant 0 : index
    %c0_18 = arith.constant 0 : index
    %19 = vector.load %arg8[%c0_17, %c0_18] : memref<1x64xf32, #tpu.memory_space<vmem>>, vector<1x64xf32>
    %20 = vector.broadcast %19 : vector<1x64xf32> to vector<128x64xf32>
    %21 = arith.addf %18, %20 : vector<128x64xf32>
    %cst_19 = arith.constant 0.000000e+00 : f32
    %22 = vector.broadcast %cst_19 : f32 to vector<128x64xf32>
    %23 = arith.maximumf %21, %22 : vector<128x64xf32>
    %24 = arith.truncf %23 : vector<128x64xf32> to vector<128x64xbf16>
    %c0_20 = arith.constant 0 : index
    %c0_21 = arith.constant 0 : index
    %25 = vector.load %arg9[%c0_20, %c0_21] : memref<64x64xbf16, #tpu.memory_space<vmem>>, vector<64x64xbf16>
    %cst_22 = arith.constant dense<0.000000e+00> : vector<128x64xf32>
    %26 = tpu.matmul %24, %25, %cst_22 {dimension_numbers = #tpu.dot_dimension_numbers<[1], [0], [0], [1], [0, 0, 1, 1], [], []>} : vector<128x64xbf16>, vector<64x64xbf16>, vector<128x64xf32> -> vector<128x64xf32>
    %c0_23 = arith.constant 0 : index
    %c0_24 = arith.constant 0 : index
    %27 = vector.load %arg10[%c0_23, %c0_24] : memref<1x64xf32, #tpu.memory_space<vmem>>, vector<1x64xf32>
    %28 = vector.broadcast %27 : vector<1x64xf32> to vector<128x64xf32>
    %29 = arith.addf %26, %28 : vector<128x64xf32>
    %cst_25 = arith.constant 0.000000e+00 : f32
    %30 = vector.broadcast %cst_25 : f32 to vector<128x64xf32>
    %31 = arith.maximumf %29, %30 : vector<128x64xf32>
    %32 = arith.truncf %16 : vector<128x64xf32> to vector<128x64xbf16>
    %33 = arith.truncf %31 : vector<128x64xf32> to vector<128x64xbf16>
    %cst_26 = arith.constant dense<0.000000e+00> : vector<128x128xf32>
    %34 = tpu.matmul %32, %33, %cst_26 {dimension_numbers = #tpu.dot_dimension_numbers<[1], [1], [0], [0], [0, 0, 1, 0], [], []>} : vector<128x64xbf16>, vector<128x64xbf16>, vector<128x128xf32> -> vector<128x128xf32>
    %c0_27 = arith.constant 0 : index
    %c0_28 = arith.constant 0 : index
    %35 = vector.load %arg3[%c0_27, %c0_28] : memref<128x128xf32, #tpu.memory_space<vmem>>, vector<128x128xf32>
    %36 = arith.addf %34, %35 : vector<128x128xf32>
    %37 = arith.truncf %31 : vector<128x64xf32> to vector<128x64xbf16>
    %38 = arith.truncf %16 : vector<128x64xf32> to vector<128x64xbf16>
    %cst_29 = arith.constant dense<0.000000e+00> : vector<128x128xf32>
    %39 = tpu.matmul %37, %38, %cst_29 {dimension_numbers = #tpu.dot_dimension_numbers<[1], [1], [0], [0], [0, 0, 1, 0], [], []>} : vector<128x64xbf16>, vector<128x64xbf16>, vector<128x128xf32> -> vector<128x128xf32>
    %c0_30 = arith.constant 0 : index
    %c0_31 = arith.constant 0 : index
    %40 = vector.load %arg4[%c0_30, %c0_31] : memref<128x128xf32, #tpu.memory_space<vmem>>, vector<128x128xf32>
    %41 = arith.addf %39, %40 : vector<128x128xf32>
    %cst_32 = arith.constant dense<0xFF800000> : vector<128xf32>
    %42 = vector.multi_reduction <maximumf>, %36, %cst_32 [1] : vector<128x128xf32> to vector<128xf32>
    %43 = vector.shape_cast %42 : vector<128xf32> to vector<128x1xf32>
    %44 = vector.broadcast %43 : vector<128x1xf32> to vector<128x128xf32>
    %45 = arith.subf %36, %44 : vector<128x128xf32>
    %46 = math.exp %45 : vector<128x128xf32>
    %cst_33 = arith.constant dense<0.000000e+00> : vector<128xf32>
    %47 = vector.multi_reduction <add>, %46, %cst_33 [1] : vector<128x128xf32> to vector<128xf32>
    %48 = vector.shape_cast %47 : vector<128xf32> to vector<128x1xf32>
    %49 = tpu.reciprocal %48 {approx = true} : vector<128x1xf32> -> vector<128x1xf32>
    %50 = vector.broadcast %49 : vector<128x1xf32> to vector<128x128xf32>
    %51 = arith.mulf %46, %50 : vector<128x128xf32>
    %52 = arith.truncf %51 : vector<128x128xf32> to vector<128x128xbf16>
    %cst_34 = arith.constant dense<0.000000e+00> : vector<128x32xf32>
    %53 = tpu.matmul %52, %1, %cst_34 {dimension_numbers = #tpu.dot_dimension_numbers<[1], [0], [0], [1], [0, 0, 1, 1], [], []>} : vector<128x128xbf16>, vector<128x32xbf16>, vector<128x32xf32> -> vector<128x32xf32>
    %cst_35 = arith.constant dense<0xFF800000> : vector<128xf32>
    %54 = vector.multi_reduction <maximumf>, %41, %cst_35 [1] : vector<128x128xf32> to vector<128xf32>
    %55 = vector.shape_cast %54 : vector<128xf32> to vector<128x1xf32>
    %56 = vector.broadcast %55 : vector<128x1xf32> to vector<128x128xf32>
    %57 = arith.subf %41, %56 : vector<128x128xf32>
    %58 = math.exp %57 : vector<128x128xf32>
    %cst_36 = arith.constant dense<0.000000e+00> : vector<128xf32>
    %59 = vector.multi_reduction <add>, %58, %cst_36 [1] : vector<128x128xf32> to vector<128xf32>
    %60 = vector.shape_cast %59 : vector<128xf32> to vector<128x1xf32>
    %61 = tpu.reciprocal %60 {approx = true} : vector<128x1xf32> -> vector<128x1xf32>
    %62 = vector.broadcast %61 : vector<128x1xf32> to vector<128x128xf32>
    %63 = arith.mulf %58, %62 : vector<128x128xf32>
    %64 = arith.truncf %63 : vector<128x128xf32> to vector<128x128xbf16>
    %cst_37 = arith.constant dense<0.000000e+00> : vector<128x32xf32>
    %65 = tpu.matmul %64, %0, %cst_37 {dimension_numbers = #tpu.dot_dimension_numbers<[1], [0], [0], [1], [0, 0, 1, 1], [], []>} : vector<128x128xbf16>, vector<128x32xbf16>, vector<128x32xf32> -> vector<128x32xf32>
    %c0_38 = arith.constant 0 : index
    %c0_39 = arith.constant 0 : index
    %66 = vector.load %arg11[%c0_38, %c0_39] : memref<32x64xbf16, #tpu.memory_space<vmem>>, vector<32x64xbf16>
    %cst_40 = arith.constant dense<0.000000e+00> : vector<128x64xf32>
    %67 = tpu.matmul %0, %66, %cst_40 {dimension_numbers = #tpu.dot_dimension_numbers<[1], [0], [0], [1], [0, 0, 1, 1], [], []>} : vector<128x32xbf16>, vector<32x64xbf16>, vector<128x64xf32> -> vector<128x64xf32>
    %68 = arith.truncf %53 : vector<128x32xf32> to vector<128x32xbf16>
    %c0_41 = arith.constant 0 : index
    %c0_42 = arith.constant 0 : index
    %69 = vector.load %arg12[%c0_41, %c0_42] : memref<32x64xbf16, #tpu.memory_space<vmem>>, vector<32x64xbf16>
    %cst_43 = arith.constant dense<0.000000e+00> : vector<128x64xf32>
    %70 = tpu.matmul %68, %69, %cst_43 {dimension_numbers = #tpu.dot_dimension_numbers<[1], [0], [0], [1], [0, 0, 1, 1], [], []>} : vector<128x32xbf16>, vector<32x64xbf16>, vector<128x64xf32> -> vector<128x64xf32>
    %71 = arith.addf %67, %70 : vector<128x64xf32>
    %c0_44 = arith.constant 0 : index
    %c0_45 = arith.constant 0 : index
    %72 = vector.load %arg13[%c0_44, %c0_45] : memref<1x64xf32, #tpu.memory_space<vmem>>, vector<1x64xf32>
    %73 = vector.broadcast %72 : vector<1x64xf32> to vector<128x64xf32>
    %74 = arith.addf %71, %73 : vector<128x64xf32>
    %cst_46 = arith.constant 0.000000e+00 : f32
    %75 = vector.broadcast %cst_46 : f32 to vector<128x64xf32>
    %76 = arith.maximumf %74, %75 : vector<128x64xf32>
    %77 = arith.truncf %76 : vector<128x64xf32> to vector<128x64xbf16>
    %c0_47 = arith.constant 0 : index
    %c0_48 = arith.constant 0 : index
    %78 = vector.load %arg14[%c0_47, %c0_48] : memref<64x64xbf16, #tpu.memory_space<vmem>>, vector<64x64xbf16>
    %cst_49 = arith.constant dense<0.000000e+00> : vector<128x64xf32>
    %79 = tpu.matmul %77, %78, %cst_49 {dimension_numbers = #tpu.dot_dimension_numbers<[1], [0], [0], [1], [0, 0, 1, 1], [], []>} : vector<128x64xbf16>, vector<64x64xbf16>, vector<128x64xf32> -> vector<128x64xf32>
    %c0_50 = arith.constant 0 : index
    %c0_51 = arith.constant 0 : index
    %80 = vector.load %arg15[%c0_50, %c0_51] : memref<1x64xf32, #tpu.memory_space<vmem>>, vector<1x64xf32>
    %81 = vector.broadcast %80 : vector<1x64xf32> to vector<128x64xf32>
    %82 = arith.addf %79, %81 : vector<128x64xf32>
    %cst_52 = arith.constant 0.000000e+00 : f32
    %83 = vector.broadcast %cst_52 : f32 to vector<128x64xf32>
    %84 = arith.maximumf %82, %83 : vector<128x64xf32>
    %c0_53 = arith.constant 0 : index
    %c0_54 = arith.constant 0 : index
    %85 = vector.load %arg11[%c0_53, %c0_54] : memref<32x64xbf16, #tpu.memory_space<vmem>>, vector<32x64xbf16>
    %cst_55 = arith.constant dense<0.000000e+00> : vector<128x64xf32>
    %86 = tpu.matmul %1, %85, %cst_55 {dimension_numbers = #tpu.dot_dimension_numbers<[1], [0], [0], [1], [0, 0, 1, 1], [], []>} : vector<128x32xbf16>, vector<32x64xbf16>, vector<128x64xf32> -> vector<128x64xf32>
    %87 = arith.truncf %65 : vector<128x32xf32> to vector<128x32xbf16>
    %c0_56 = arith.constant 0 : index
    %c0_57 = arith.constant 0 : index
    %88 = vector.load %arg12[%c0_56, %c0_57] : memref<32x64xbf16, #tpu.memory_space<vmem>>, vector<32x64xbf16>
    %cst_58 = arith.constant dense<0.000000e+00> : vector<128x64xf32>
    %89 = tpu.matmul %87, %88, %cst_58 {dimension_numbers = #tpu.dot_dimension_numbers<[1], [0], [0], [1], [0, 0, 1, 1], [], []>} : vector<128x32xbf16>, vector<32x64xbf16>, vector<128x64xf32> -> vector<128x64xf32>
    %90 = arith.addf %86, %89 : vector<128x64xf32>
    %c0_59 = arith.constant 0 : index
    %c0_60 = arith.constant 0 : index
    %91 = vector.load %arg13[%c0_59, %c0_60] : memref<1x64xf32, #tpu.memory_space<vmem>>, vector<1x64xf32>
    %92 = vector.broadcast %91 : vector<1x64xf32> to vector<128x64xf32>
    %93 = arith.addf %90, %92 : vector<128x64xf32>
    %cst_61 = arith.constant 0.000000e+00 : f32
    %94 = vector.broadcast %cst_61 : f32 to vector<128x64xf32>
    %95 = arith.maximumf %93, %94 : vector<128x64xf32>
    %96 = arith.truncf %95 : vector<128x64xf32> to vector<128x64xbf16>
    %c0_62 = arith.constant 0 : index
    %c0_63 = arith.constant 0 : index
    %97 = vector.load %arg14[%c0_62, %c0_63] : memref<64x64xbf16, #tpu.memory_space<vmem>>, vector<64x64xbf16>
    %cst_64 = arith.constant dense<0.000000e+00> : vector<128x64xf32>
    %98 = tpu.matmul %96, %97, %cst_64 {dimension_numbers = #tpu.dot_dimension_numbers<[1], [0], [0], [1], [0, 0, 1, 1], [], []>} : vector<128x64xbf16>, vector<64x64xbf16>, vector<128x64xf32> -> vector<128x64xf32>
    %c0_65 = arith.constant 0 : index
    %c0_66 = arith.constant 0 : index
    %99 = vector.load %arg15[%c0_65, %c0_66] : memref<1x64xf32, #tpu.memory_space<vmem>>, vector<1x64xf32>
    %100 = vector.broadcast %99 : vector<1x64xf32> to vector<128x64xf32>
    %101 = arith.addf %98, %100 : vector<128x64xf32>
    %cst_67 = arith.constant 0.000000e+00 : f32
    %102 = vector.broadcast %cst_67 : f32 to vector<128x64xf32>
    %103 = arith.maximumf %101, %102 : vector<128x64xf32>
    %c0_68 = arith.constant 0 : index
    %c0_69 = arith.constant 0 : index
    %104 = vector.load %arg5[%c0_68, %c0_69] : memref<16x128xbf16, #tpu.memory_space<vmem>>, vector<16x128xbf16>
    %105 = arith.truncf %84 : vector<128x64xf32> to vector<128x64xbf16>
    %cst_70 = arith.constant dense<0.000000e+00> : vector<16x64xf32>
    %106 = tpu.matmul %104, %105, %cst_70 {dimension_numbers = #tpu.dot_dimension_numbers<[1], [0], [0], [1], [0, 0, 1, 1], [], []>} : vector<16x128xbf16>, vector<128x64xbf16>, vector<16x64xf32> -> vector<16x64xf32>
    %c0_71 = arith.constant 0 : index
    %c0_72 = arith.constant 0 : index
    %107 = vector.load %arg6[%c0_71, %c0_72] : memref<16x128xbf16, #tpu.memory_space<vmem>>, vector<16x128xbf16>
    %108 = arith.truncf %103 : vector<128x64xf32> to vector<128x64xbf16>
    %cst_73 = arith.constant dense<0.000000e+00> : vector<16x64xf32>
    %109 = tpu.matmul %107, %108, %cst_73 {dimension_numbers = #tpu.dot_dimension_numbers<[1], [0], [0], [1], [0, 0, 1, 1], [], []>} : vector<16x128xbf16>, vector<128x64xbf16>, vector<16x64xf32> -> vector<16x64xf32>
    %110 = arith.truncf %106 : vector<16x64xf32> to vector<16x64xbf16>
    %c0_74 = arith.constant 0 : index
    %c0_75 = arith.constant 0 : index
    %111 = vector.load %arg16[%c0_74, %c0_75] : memref<64x64xbf16, #tpu.memory_space<vmem>>, vector<64x64xbf16>
    %cst_76 = arith.constant dense<0.000000e+00> : vector<16x64xf32>
    %112 = tpu.matmul %110, %111, %cst_76 {dimension_numbers = #tpu.dot_dimension_numbers<[1], [0], [0], [1], [0, 0, 1, 1], [], []>} : vector<16x64xbf16>, vector<64x64xbf16>, vector<16x64xf32> -> vector<16x64xf32>
    %113 = arith.truncf %109 : vector<16x64xf32> to vector<16x64xbf16>
    %c0_77 = arith.constant 0 : index
    %c0_78 = arith.constant 0 : index
    %114 = vector.load %arg17[%c0_77, %c0_78] : memref<64x64xbf16, #tpu.memory_space<vmem>>, vector<64x64xbf16>
    %cst_79 = arith.constant dense<0.000000e+00> : vector<16x64xf32>
    %115 = tpu.matmul %113, %114, %cst_79 {dimension_numbers = #tpu.dot_dimension_numbers<[1], [0], [0], [1], [0, 0, 1, 1], [], []>} : vector<16x64xbf16>, vector<64x64xbf16>, vector<16x64xf32> -> vector<16x64xf32>
    %116 = arith.addf %112, %115 : vector<16x64xf32>
    %c0_80 = arith.constant 0 : index
    %c0_81 = arith.constant 0 : index
    %117 = vector.load %arg18[%c0_80, %c0_81] : memref<1x64xf32, #tpu.memory_space<vmem>>, vector<1x64xf32>
    %118 = vector.broadcast %117 : vector<1x64xf32> to vector<16x64xf32>
    %119 = arith.addf %116, %118 : vector<16x64xf32>
    %cst_82 = arith.constant 0.000000e+00 : f32
    %120 = vector.broadcast %cst_82 : f32 to vector<16x64xf32>
    %121 = arith.maximumf %119, %120 : vector<16x64xf32>
    %122 = arith.truncf %121 : vector<16x64xf32> to vector<16x64xbf16>
    %c0_83 = arith.constant 0 : index
    %c0_84 = arith.constant 0 : index
    %123 = vector.load %arg19[%c0_83, %c0_84] : memref<64x64xbf16, #tpu.memory_space<vmem>>, vector<64x64xbf16>
    %cst_85 = arith.constant dense<0.000000e+00> : vector<16x64xf32>
    %124 = tpu.matmul %122, %123, %cst_85 {dimension_numbers = #tpu.dot_dimension_numbers<[1], [0], [0], [1], [0, 0, 1, 1], [], []>} : vector<16x64xbf16>, vector<64x64xbf16>, vector<16x64xf32> -> vector<16x64xf32>
    %c0_86 = arith.constant 0 : index
    %c0_87 = arith.constant 0 : index
    %125 = vector.load %arg20[%c0_86, %c0_87] : memref<1x64xf32, #tpu.memory_space<vmem>>, vector<1x64xf32>
    %126 = vector.broadcast %125 : vector<1x64xf32> to vector<16x64xf32>
    %127 = arith.addf %124, %126 : vector<16x64xf32>
    %cst_88 = arith.constant 0.000000e+00 : f32
    %128 = vector.broadcast %cst_88 : f32 to vector<16x64xf32>
    %129 = arith.maximumf %127, %128 : vector<16x64xf32>
    %130 = arith.truncf %129 : vector<16x64xf32> to vector<16x64xbf16>
    %c0_89 = arith.constant 0 : index
    %c0_90 = arith.constant 0 : index
    %131 = vector.load %arg21[%c0_89, %c0_90] : memref<64x128xbf16, #tpu.memory_space<vmem>>, vector<64x128xbf16>
    %cst_91 = arith.constant dense<0.000000e+00> : vector<16x128xf32>
    %132 = tpu.matmul %130, %131, %cst_91 {dimension_numbers = #tpu.dot_dimension_numbers<[1], [0], [0], [1], [0, 0, 1, 1], [], []>} : vector<16x64xbf16>, vector<64x128xbf16>, vector<16x128xf32> -> vector<16x128xf32>
    %c0_92 = arith.constant 0 : index
    %c0_93 = arith.constant 0 : index
    %133 = vector.load %arg22[%c0_92, %c0_93] : memref<1x128xf32, #tpu.memory_space<vmem>>, vector<1x128xf32>
    %134 = vector.broadcast %133 : vector<1x128xf32> to vector<16x128xf32>
    %135 = arith.addf %132, %134 : vector<16x128xf32>
    %c0_94 = arith.constant 0 : index
    %c0_95 = arith.constant 0 : index
    %136 = vector.load %arg23[%c0_94, %c0_95] : memref<16x128xf32, #tpu.memory_space<vmem>>, vector<16x128xf32>
    tpu.vector_store %arg23[%c0_94, %c0_95], %135 {strides = array<i32>} : memref<16x128xf32, #tpu.memory_space<vmem>>, vector<16x128xf32>,
    return
  }
  func.func @transform_0(%arg0: i32) -> (i32, i32) {
    %c0_i32 = arith.constant 0 : i32
    %c0_i32_0 = arith.constant 0 : i32
    return %arg0, %c0_i32 : i32, i32
  }
  func.func @transform_1(%arg0: i32) -> (i32, i32) {
    %c0_i32 = arith.constant 0 : i32
    %c0_i32_0 = arith.constant 0 : i32
    return %arg0, %c0_i32 : i32, i32
  }
  func.func @transform_2(%arg0: i32) -> (i32, i32) {
    %c0_i32 = arith.constant 0 : i32
    %c0_i32_0 = arith.constant 0 : i32
    %c0_i32_1 = arith.constant 0 : i32
    return %c0_i32, %c0_i32_0 : i32, i32
  }
  func.func @transform_3(%arg0: i32) -> (i32, i32) {
    %c0_i32 = arith.constant 0 : i32
    %c0_i32_0 = arith.constant 0 : i32
    %c0_i32_1 = arith.constant 0 : i32
    return %c0_i32, %c0_i32_0 : i32, i32
  }
  func.func @transform_4(%arg0: i32) -> (i32, i32) {
    %c0_i32 = arith.constant 0 : i32
    %c0_i32_0 = arith.constant 0 : i32
    %c0_i32_1 = arith.constant 0 : i32
    return %c0_i32, %c0_i32_0 : i32, i32
  }
  func.func @transform_5(%arg0: i32) -> (i32, i32) {
    %c0_i32 = arith.constant 0 : i32
    %c0_i32_0 = arith.constant 0 : i32
    %c0_i32_1 = arith.constant 0 : i32
    return %c0_i32, %c0_i32_0 : i32, i32
  }
  func.func @transform_6(%arg0: i32) -> (i32, i32) {
    %c0_i32 = arith.constant 0 : i32
    %c0_i32_0 = arith.constant 0 : i32
    %c0_i32_1 = arith.constant 0 : i32
    return %c0_i32, %c0_i32_0 : i32, i32
  }
  func.func @transform_7(%arg0: i32) -> (i32, i32) {
    %c0_i32 = arith.constant 0 : i32
    %c0_i32_0 = arith.constant 0 : i32
    %c0_i32_1 = arith.constant 0 : i32
    return %c0_i32, %c0_i32_0 : i32, i32
  }
  func.func @transform_8(%arg0: i32) -> (i32, i32) {
    %c0_i32 = arith.constant 0 : i32
    %c0_i32_0 = arith.constant 0 : i32
    %c0_i32_1 = arith.constant 0 : i32
    return %c0_i32, %c0_i32_0 : i32, i32
  }
  func.func @transform_9(%arg0: i32) -> (i32, i32) {
    %c0_i32 = arith.constant 0 : i32
    %c0_i32_0 = arith.constant 0 : i32
    %c0_i32_1 = arith.constant 0 : i32
    return %c0_i32, %c0_i32_0 : i32, i32
  }
  func.func @transform_10(%arg0: i32) -> (i32, i32) {
    %c0_i32 = arith.constant 0 : i32
    %c0_i32_0 = arith.constant 0 : i32
    %c0_i32_1 = arith.constant 0 : i32
    return %c0_i32, %c0_i32_0 : i32, i32
  }
  func.func @transform_11(%arg0: i32) -> (i32, i32) {
    %c0_i32 = arith.constant 0 : i32
    %c0_i32_0 = arith.constant 0 : i32
    %c0_i32_1 = arith.constant 0 : i32
    return %c0_i32, %c0_i32_0 : i32, i32
  }
  func.func @transform_12(%arg0: i32) -> (i32, i32) {
    %c0_i32 = arith.constant 0 : i32
    %c0_i32_0 = arith.constant 0 : i32
    %c0_i32_1 = arith.constant 0 : i32
    return %c0_i32, %c0_i32_0 : i32, i32
  }
  func.func @transform_13(%arg0: i32) -> (i32, i32) {
    %c0_i32 = arith.constant 0 : i32
    %c0_i32_0 = arith.constant 0 : i32
    %c0_i32_1 = arith.constant 0 : i32
    return %c0_i32, %c0_i32_0 : i32, i32
  }
  func.func @transform_14(%arg0: i32) -> (i32, i32) {
    %c0_i32 = arith.constant 0 : i32
    %c0_i32_0 = arith.constant 0 : i32
    %c0_i32_1 = arith.constant 0 : i32
    return %c0_i32, %c0_i32_0 : i32, i32
  }
  func.func @transform_15(%arg0: i32) -> (i32, i32) {
    %c0_i32 = arith.constant 0 : i32
    %c0_i32_0 = arith.constant 0 : i32
    %c0_i32_1 = arith.constant 0 : i32
    return %c0_i32, %c0_i32_0 : i32, i32
  }
  func.func @transform_16(%arg0: i32) -> (i32, i32) {
    %c0_i32 = arith.constant 0 : i32
    %c0_i32_0 = arith.constant 0 : i32
    %c0_i32_1 = arith.constant 0 : i32
    return %c0_i32, %c0_i32_0 : i32, i32
  }
  func.func @transform_17(%arg0: i32) -> (i32, i32) {
    %c0_i32 = arith.constant 0 : i32
    %c0_i32_0 = arith.constant 0 : i32
    %c0_i32_1 = arith.constant 0 : i32
    return %c0_i32, %c0_i32_0 : i32, i32
  }
  func.func @transform_18(%arg0: i32) -> (i32, i32) {
    %c0_i32 = arith.constant 0 : i32
    %c0_i32_0 = arith.constant 0 : i32
    %c0_i32_1 = arith.constant 0 : i32
    return %c0_i32, %c0_i32_0 : i32, i32
  }
  func.func @transform_19(%arg0: i32) -> (i32, i32) {
    %c0_i32 = arith.constant 0 : i32
    %c0_i32_0 = arith.constant 0 : i32
    %c0_i32_1 = arith.constant 0 : i32
    return %c0_i32, %c0_i32_0 : i32, i32
  }
  func.func @transform_20(%arg0: i32) -> (i32, i32) {
    %c0_i32 = arith.constant 0 : i32
    %c0_i32_0 = arith.constant 0 : i32
    %c0_i32_1 = arith.constant 0 : i32
    return %c0_i32, %c0_i32_0 : i32, i32
  }
  func.func @transform_21(%arg0: i32) -> (i32, i32) {
    %c0_i32 = arith.constant 0 : i32
    %c0_i32_0 = arith.constant 0 : i32
    %c0_i32_1 = arith.constant 0 : i32
    return %c0_i32, %c0_i32_0 : i32, i32
  }
  func.func @transform_22(%arg0: i32) -> (i32, i32) {
    %c0_i32 = arith.constant 0 : i32
    %c0_i32_0 = arith.constant 0 : i32
    return %arg0, %c0_i32 : i32, i32
  }
}

</mosaic_0001>

<bundles_post_ra>
// kernel: decomposable_attention_forward.1
= control target key start
LH: loop header
LB: loop body
LE: loop exit
PB: predicated region body
PF: predicated region fallthrough
CT: control target
= control target key end

     0   :  { %vm167_vm0 = vcmask 261120   ;;  %vm352_vm1 = vcmask 523264   ;;  %vm3995_vm2 = vmmov 0   ;;  %s5286_s6 = inlined_call_operand.vmem [shape: bf16[32,64], index: 6, kind: input, shape index: {}]   ;;  %s5287_s0 = inlined_call_operand.vmem [shape: bf16[128,32], index: 0, kind: input, shape index: {}]   ;;  %s5288_s1 = inlined_call_operand.vmem [shape: bf16[128,32], index: 1, kind: input, shape index: {}]   ;;  %s5289_s8 = inlined_call_operand.vmem [shape: bf16[64,64], index: 8, kind: input, shape index: {}]   ;;  %s5290_s7 = inlined_call_operand.vmem [shape: f32[1,64], index: 7, kind: input, shape index: {}]   ;;  %s5291_s9 = inlined_call_operand.vmem [shape: f32[1,64], index: 9, kind: input, shape index: {}]   ;;  %s5292_s2 = inlined_call_operand.vmem [shape: f32[128,128], index: 2, kind: input, shape index: {}]   ;;  %s5293_s3 = inlined_call_operand.vmem [shape: f32[128,128], index: 3, kind: input, shape index: {}]   ;;  %s5294_s11 = inlined_call_operand.vmem [shape: bf16[32,64], index: 11, kind: input, shape index: {}]   ;;  %s5295_s10 = inlined_call_operand.vmem [shape: bf16[32,64], index: 10, kind: input, shape index: {}]   ;;  %s5296_s13 = inlined_call_operand.vmem [shape: bf16[64,64], index: 13, kind: input, shape index: {}]   ;;  %s5297_s12 = inlined_call_operand.vmem [shape: f32[1,64], index: 12, kind: input, shape index: {}]   ;;  %s5298_s14 = inlined_call_operand.vmem [shape: f32[1,64], index: 14, kind: input, shape index: {}]   ;;  %s5299_s4 = inlined_call_operand.vmem [shape: bf16[16,128], index: 4, kind: input, shape index: {}, may-alias: {4,5}]   ;;  %s5300_s5 = inlined_call_operand.vmem [shape: bf16[16,128], index: 5, kind: input, shape index: {}, may-alias: {4,5}]   ;;  %s5301_s15 = inlined_call_operand.vmem [shape: bf16[64,64], index: 15, kind: input, shape index: {}]   ;;  %s5302_s16 = inlined_call_operand.vmem [shape: bf16[64,64], index: 16, kind: input, shape index: {}]   ;;  %s5303_s18 = inlined_call_operand.vmem [shape: bf16[64,64], index: 18, kind: input, shape index: {}]   ;;  %s5304_s20 = inlined_call_operand.vmem [shape: bf16[64,128], index: 20, kind: input, shape index: {}]   ;;  %s5305_s17 = inlined_call_operand.vmem [shape: f32[1,64], index: 17, kind: input, shape index: {}]   ;;  %s5306_s19 = inlined_call_operand.vmem [shape: f32[1,64], index: 19, kind: input, shape index: {}]   ;;  %s5307_s21 = inlined_call_operand.vmem [shape: f32[1,128], index: 21, kind: input, shape index: {}]   ;;  %s5308_s22 = inlined_call_operand.vmem [shape: f32[16,128], index: 22, kind: output, shape index: {}]  }
   0x1   :  { %5314 = sst [smem:[#allocation2_spill]] %s5286_s6 }
   0x2   :  { %5315 = sst [smem:[#allocation3_spill]] %s5287_s0  ;;  %s5321_s29 = sld [smem:[#allocation2_spill]] }
   0x3   :  { %5316 = sst [smem:[#allocation4_spill]] %s5288_s1  ;;  %s5322_s0 = sld [smem:[#allocation3_spill]] }
   0x4   :  { %5317 = sst [smem:[#allocation5_spill]] %s5289_s8  ;;  %s5324_s8 = sld [smem:[#allocation4_spill]] }
   0x5   :  { %5318 = sst [smem:[#allocation6_spill]] %s5290_s7  ;;  %s5323_s30 = sld [smem:[#allocation5_spill]] }
   0x6   :  { %5319 = sst [smem:[#allocation7_spill]] %s5291_s9  ;;  %s5325_s25 = sld [smem:[#allocation6_spill]] }
   0x7   :  { %5320 = sst [smem:[#allocation8_spill]] %s5292_s2  ;;  %s5326_s1 = sld [smem:[#allocation7_spill]] }
   0x8   :  { %v3802_v0 = vld [vmem:[%s5321_s29] sm:$0xff]   ;;  %v3803_v1 = vld [vmem:[%s5321_s29 + $0x8] sm:$0xff]   ;;  %s5327_s29 = sld [smem:[#allocation8_spill]] }
   0x9   :  { %3320 = vmatprep.subr.bf16.mxu0 %v3802_v0  ;;  %v4120_v2 = vld [vmem:[%s5322_s0] sm:$0xff]   ;;  %v4127_v3 = vld [vmem:[%s5322_s0 + $0x8] sm:$0xff]   ;;  %v4132_v4 = vld [vmem:[%s5322_s0 + $0x10] sm:$0xff]  }
   0xa   :  { %3321 = vmatpush3.bf16.msra.mxu0 %v3802_v0  ;;  %3324 = vmatprep.mubr.msk.bf16.mxu0 %vm167_vm0, %v4120_v2  ;;  %v4141_v5 = vld [vmem:[%s5322_s0 + $0x18] sm:$0xff]   ;;  %v4146_v6 = vld [vmem:[%s5322_s0 + $0x20] sm:$0xff]   ;;  %v4167_v9 = vld [vmem:[%s5322_s0 + $0x28] sm:$0xff]  }
   0xb   :  { %3322 = vmatprep.subr.bf16.mxu0 %v3803_v1  ;;  %v4153_v7 = vld [vmem:[%s5323_s30] sm:$0xff]   ;;  %v4160_v8 = vld [vmem:[%s5323_s30 + $0x8] sm:$0xff]   ;;  %v4173_v10 = vld [vmem:[%s5322_s0 + $0x30] sm:$0xff]  }
   0xc   :  { %3340 = vmatprep.subr.bf16.mxu1 %v4153_v7  ;;  %v4183_v11 = vld [vmem:[%s5322_s0 + $0x38] sm:$0xff]   ;;  %v4188_v12 = vld [vmem:[%s5324_s8] sm:$0xff]   ;;  %v4197_v13 = vld [vmem:[%s5324_s8 + $0x8] sm:$0xff]  }
   0xd   :  { %3341 = vmatpush3.bf16.msra.mxu1 %v4153_v7  ;;  %v4202_v14 = vld [vmem:[%s5324_s8 + $0x10] sm:$0xff]   ;;  %v4211_v15 = vld [vmem:[%s5324_s8 + $0x18] sm:$0xff]   ;;  %v4216_v16 = vld [vmem:[%s5324_s8 + $0x20] sm:$0xff]  }
   0xe   :  { %3323 = vmatpush3.bf16.msra.mxu0 %v3803_v1  ;;  %3342 = vmatprep.subr.bf16.mxu1 %v4160_v8  ;;  %v4225_v17 = vld [vmem:[%s5324_s8 + $0x28] sm:$0xff]   ;;  %v4230_v18 = vld [vmem:[%s5324_s8 + $0x30] sm:$0xff]   ;;  %v4239_v19 = vld [vmem:[%s5324_s8 + $0x38] sm:$0xff]  }
   0xf   :  { %3364 = vmatprep.subr.bf16.mxu0 %v3802_v0  ;;  %v3822_v20 = vld [vmem:[%s5323_s30 + $0x10] sm:$0xff]   ;;  %v3823_v21 = vld [vmem:[%s5323_s30 + $0x18] sm:$0xff]   ;;  %v4253_v22 = vld [vmem:[%s5325_s25] ss:$0 sm:$0xff] }
  0x11   :  { %3325 = vmatmul.mubr.msk.bf16.vlgmr.msra.gmra.mrb[0].mxu0 %vm167_vm0, %v4127_v3  ;;  %3343 = vmatpush3.bf16.msra.mxu1 %v4160_v8 }
  0x12   :  { %3365 = vmatpush3.bf16.msra.mxu0 %v3802_v0  ;;  %3328 = vmatprep.mubr.msk.bf16.mxu0 %vm167_vm0, %v4132_v4 }
  0x13   :  { %3366 = vmatprep.subr.bf16.mxu0 %v3803_v1  ;;  %3344 = vmatprep.subr.bf16.mxu1 %v3822_v20 }
  0x15   :  { %3345 = vmatpush3.bf16.msra.mxu1 %v3822_v20 }
  0x16   :  { %3367 = vmatpush3.bf16.msra.mxu0 %v3803_v1  ;;  %3346 = vmatprep.subr.bf16.mxu1 %v3823_v21 }
  0x19   :  { %3329 = vmatmul.mubr.msk.bf16.gmra.mrb[4].mxu0 %vm167_vm0, %v4141_v5  ;;  %3347 = vmatpush3.bf16.msra.mxu1 %v3823_v21 }
  0x1a   :  { %3332 = vmatprep.mubr.msk.bf16.mxu0 %vm167_vm0, %v4146_v6  ;;  %3384 = vmatprep.subr.bf16.mxu1 %v4153_v7 }
  0x21   :  { %3333 = vmatmul.mubr.msk.bf16.gmra.mrb[8].mxu0 %vm167_vm0, %v4167_v9 }
  0x22   :  { %3336 = vmatprep.mubr.msk.bf16.mxu0 %vm167_vm0, %v4173_v10 }
  0x29   :  { %3337 = vmatmul.mubr.msk.bf16.gmra.mrb[12].mxu0 %vm167_vm0, %v4183_v11 }
  0x2a   :  { %3368 = vmatprep.mubr.msk.bf16.mxu0 %vm167_vm0, %v4188_v12 }
  0x31   :  { %3369 = vmatmul.mubr.msk.bf16.vlgmr.msra.gmra.mrb[16].mxu0 %vm167_vm0, %v4197_v13 }
  0x32   :  { %3372 = vmatprep.mubr.msk.bf16.mxu0 %vm167_vm0, %v4202_v14 }
  0x39   :  { %3373 = vmatmul.mubr.msk.bf16.gmra.mrb[20].mxu0 %vm167_vm0, %v4211_v15 }
  0x3a   :  { %3376 = vmatprep.mubr.msk.bf16.mxu0 %vm167_vm0, %v4216_v16 }
  0x41   :  { %3377 = vmatmul.mubr.msk.bf16.gmra.mrb[24].mxu0 %vm167_vm0, %v4225_v17 }
  0x42   :  { %3380 = vmatprep.mubr.msk.bf16.mxu0 %vm167_vm0, %v4230_v18 }
  0x49   :  { %3381 = vmatmul.mubr.msk.bf16.gmra.mrb[28].mxu0 %vm167_vm0, %v4239_v19 }
  0xe4   :  { %v3326_v23 = vpop.f32.mrb[0].mxu0 }
  0xe5   :  { %v235_v24 = vadd.f32 %v3326_v23, %v4253_v22  ;;  %v226_v25 = vpop.f32.mrb[1].mxu0 }
  0xe6   :  { %v227_v26 = vadd.f32 %v4253_v22, %v226_v25  ;;  %v3327_v27 = vpop.f32.mrb[2].mxu0 }
  0xe7   :  { %v238_v28 = vadd.f32 %v3327_v27, %v4253_v22  ;;  %v229_v29 = vpop.f32.mrb[3].mxu0  ;;  %v291_v31 = vmax.f32 %v235_v24, 0.0 }
  0xe8   :  { %v230_v30 = vadd.f32 %v4253_v22, %v229_v29  ;;  %v289_v33 = vmax.f32 %v227_v26, 0.0 }
  0xe9   :  { %v292_v32 = vmax.f32 %v238_v28, 0.0 }
  0xea   :  { %v290_v34 = vmax.f32 %v230_v30, 0.0 }
  0xeb   :  { %v306_v35 = vpack.c.bf16 %v292_v32, %v291_v31 }
  0xec   :  { %v3330_v36 = vpop.f32.mrb[4].mxu0  ;;  %v305_v37 = vpack.c.bf16 %v290_v34, %v289_v33 }
  0xed   :  { %v251_v38 = vadd.f32 %v3330_v36, %v4253_v22  ;;  %v242_v39 = vpop.f32.mrb[5].mxu0 }
  0xee   :  { %v243_v40 = vadd.f32 %v4253_v22, %v242_v39  ;;  %v3331_v41 = vpop.f32.mrb[6].mxu0  ;;  %3348 = vmatprep.mubr.msk.bf16.mxu1 %vm352_vm1, %v305_v37 }
  0xef   :  { %v254_v42 = vadd.f32 %v3331_v41, %v4253_v22  ;;  %v245_v43 = vpop.f32.mrb[7].mxu0  ;;  %3349 = vmatmul.mubr.msk.bf16.vlgmr.msra.gmra.mrb[0].mxu1 %vm352_vm1, %v306_v35  ;;  %v295_v45 = vmax.f32 %v251_v38, 0.0 }
  0xf0   :  { %v246_v44 = vadd.f32 %v4253_v22, %v245_v43  ;;  %3385 = vmatpush3.bf16.msra.mxu1 %v4153_v7  ;;  %v293_v47 = vmax.f32 %v243_v40, 0.0 }
  0xf1   :  { %v296_v46 = vmax.f32 %v254_v42, 0.0  ;;  %3386 = vmatprep.subr.bf16.mxu1 %v4160_v8 }
  0xf2   :  { %v294_v48 = vmax.f32 %v246_v44, 0.0 }
  0xf3   :  { %v308_v49 = vpack.c.bf16 %v296_v46, %v295_v45 }
  0xf4   :  { %v307_v50 = vpack.c.bf16 %v294_v48, %v293_v47  ;;  %v3334_v51 = vpop.f32.mrb[8].mxu0  ;;  %3387 = vmatpush3.bf16.msra.mxu1 %v4160_v8 }
  0xf5   :  { %v267_v52 = vadd.f32 %v3334_v51, %v4253_v22  ;;  %v258_v53 = vpop.f32.mrb[9].mxu0  ;;  %3388 = vmatprep.subr.bf16.mxu1 %v3822_v20 }
  0xf6   :  { %v259_v54 = vadd.f32 %v4253_v22, %v258_v53  ;;  %v3335_v55 = vpop.f32.mrb[10].mxu0  ;;  %3352 = vmatprep.mubr.msk.bf16.mxu1 %vm352_vm1, %v307_v50 }
  0xf7   :  { %v270_v56 = vadd.f32 %v3335_v55, %v4253_v22  ;;  %v261_v57 = vpop.f32.mrb[11].mxu0  ;;  %3353 = vmatmul.mubr.msk.bf16.gmra.mrb[4].mxu1 %vm352_vm1, %v308_v49  ;;  %v299_v59 = vmax.f32 %v267_v52, 0.0 }
  0xf8   :  { %v262_v58 = vadd.f32 %v4253_v22, %v261_v57  ;;  %3389 = vmatpush3.bf16.msra.mxu1 %v3822_v20  ;;  %v297_v61 = vmax.f32 %v259_v54, 0.0 }
  0xf9   :  { %v300_v60 = vmax.f32 %v270_v56, 0.0  ;;  %3390 = vmatprep.subr.bf16.mxu1 %v3823_v21 }
  0xfa   :  { %v298_v62 = vmax.f32 %v262_v58, 0.0 }
  0xfb   :  { %v310_v63 = vpack.c.bf16 %v300_v60, %v299_v59 }
  0xfc   :  { %v309_v0 = vpack.c.bf16 %v298_v62, %v297_v61  ;;  %v3338_v1 = vpop.f32.mrb[12].mxu0  ;;  %3391 = vmatpush3.bf16.msra.mxu1 %v3823_v21 }
  0xfd   :  { %v283_v7 = vadd.f32 %v3338_v1, %v4253_v22  ;;  %v274_v8 = vpop.f32.mrb[13].mxu0 }
  0xfe   :  { %v275_v23 = vadd.f32 %v4253_v22, %v274_v8  ;;  %v3339_v24 = vpop.f32.mrb[14].mxu0  ;;  %3356 = vmatprep.mubr.msk.bf16.mxu1 %vm352_vm1, %v309_v0 }
  0xff   :  { %v286_v25 = vadd.f32 %v3339_v24, %v4253_v22  ;;  %v277_v20 = vpop.f32.mrb[15].mxu0  ;;  %3357 = vmatmul.mubr.msk.bf16.gmra.mrb[8].mxu1 %vm352_vm1, %v310_v63  ;;  %v303_v27 = vmax.f32 %v283_v7, 0.0 }
 0x100   :  { %v278_v26 = vadd.f32 %v4253_v22, %v277_v20  ;;  %v301_v29 = vmax.f32 %v275_v23, 0.0 }
 0x101   :  { %v304_v28 = vmax.f32 %v286_v25, 0.0 }
 0x102   :  { %v302_v30 = vmax.f32 %v278_v26, 0.0 }
 0x103   :  { %v312_v21 = vpack.c.bf16 %v304_v28, %v303_v27 }
 0x104   :  { %v311_v31 = vpack.c.bf16 %v302_v30, %v301_v29  ;;  %v3370_v32 = vpop.f32.mrb[16].mxu0 }
 0x105   :  { %v597_v33 = vadd.f32 %v3370_v32, %v4253_v22  ;;  %v588_v34 = vpop.f32.mrb[17].mxu0 }
 0x106   :  { %v589_v35 = vadd.f32 %v4253_v22, %v588_v34  ;;  %3360 = vmatprep.mubr.msk.bf16.mxu1 %vm352_vm1, %v311_v31  ;;  %v3371_v36 = vpop.f32.mrb[18].mxu0 }
 0x107   :  { %v600_v37 = vadd.f32 %v3371_v36, %v4253_v22  ;;  %3361 = vmatmul.mubr.msk.bf16.gmra.mrb[12].mxu1 %vm352_vm1, %v312_v21  ;;  %v591_v38 = vpop.f32.mrb[19].mxu0  ;;  %v653_v40 = vmax.f32 %v597_v33, 0.0 }
 0x108   :  { %v592_v39 = vadd.f32 %v4253_v22, %v591_v38  ;;  %v651_v42 = vmax.f32 %v589_v35, 0.0 }
 0x109   :  { %v654_v41 = vmax.f32 %v600_v37, 0.0 }
 0x10a   :  { %v652_v43 = vmax.f32 %v592_v39, 0.0 }
 0x10b   :  { %v668_v44 = vpack.c.bf16 %v654_v41, %v653_v40  ;;  %v4309_v41 = vld [vmem:[%s5326_s1] ss:$0 sm:$0xff] }
 0x10c   :  { %v667_v45 = vpack.c.bf16 %v652_v43, %v651_v42  ;;  %v3374_v46 = vpop.f32.mrb[20].mxu0 }
 0x10d   :  { %v613_v47 = vadd.f32 %v3374_v46, %v4253_v22  ;;  %v604_v48 = vpop.f32.mrb[21].mxu0 }
 0x10e   :  { %v605_v49 = vadd.f32 %v4253_v22, %v604_v48  ;;  %3392 = vmatprep.mubr.msk.bf16.mxu1 %vm352_vm1, %v667_v45  ;;  %v3375_v50 = vpop.f32.mrb[22].mxu0 }
 0x10f   :  { %v657_v51 = vmax.f32 %v613_v47, 0.0  ;;  %v616_v52 = vadd.f32 %v3375_v50, %v4253_v22  ;;  %3393 = vmatmul.mubr.msk.bf16.vlgmr.msra.gmra.mrb[16].mxu1 %vm352_vm1, %v668_v44  ;;  %v607_v53 = vpop.f32.mrb[23].mxu0 }
 0x110   :  { %v655_v54 = vmax.f32 %v605_v49, 0.0  ;;  %v608_v55 = vadd.f32 %v4253_v22, %v607_v53 }
 0x111   :  { %v658_v56 = vmax.f32 %v616_v52, 0.0 }
 0x112   :  { %v656_v57 = vmax.f32 %v608_v55, 0.0 }
 0x113   :  { %v670_v58 = vpack.c.bf16 %v658_v56, %v657_v51 }
 0x114   :  { %v669_v59 = vpack.c.bf16 %v656_v57, %v655_v54  ;;  %v3378_v60 = vpop.f32.mrb[24].mxu0 }
 0x115   :  { %v629_v61 = vadd.f32 %v3378_v60, %v4253_v22  ;;  %v620_v62 = vpop.f32.mrb[25].mxu0 }
 0x116   :  { %3396 = vmatprep.mubr.msk.bf16.mxu1 %vm352_vm1, %v669_v59  ;;  %v621_v63 = vadd.f32 %v4253_v22, %v620_v62  ;;  %v3379_v0 = vpop.f32.mrb[26].mxu0 }
 0x117   :  { %3397 = vmatmul.mubr.msk.bf16.gmra.mrb[20].mxu1 %vm352_vm1, %v670_v58  ;;  %v661_v1 = vmax.f32 %v629_v61, 0.0  ;;  %v632_v7 = vadd.f32 %v3379_v0, %v4253_v22  ;;  %v623_v8 = vpop.f32.mrb[27].mxu0 }
 0x118   :  { %v659_v23 = vmax.f32 %v621_v63, 0.0  ;;  %v624_v24 = vadd.f32 %v4253_v22, %v623_v8 }
 0x119   :  { %v662_v25 = vmax.f32 %v632_v7, 0.0 }
 0x11a   :  { %v660_v20 = vmax.f32 %v624_v24, 0.0 }
 0x11b   :  { %v672_v26 = vpack.c.bf16 %v662_v25, %v661_v1 }
 0x11c   :  { %v671_v27 = vpack.c.bf16 %v660_v20, %v659_v23  ;;  %v3382_v28 = vpop.f32.mrb[28].mxu0 }
 0x11d   :  { %v645_v29 = vadd.f32 %v3382_v28, %v4253_v22  ;;  %v636_v30 = vpop.f32.mrb[29].mxu0 }
 0x11e   :  { %3400 = vmatprep.mubr.msk.bf16.mxu1 %vm352_vm1, %v671_v27  ;;  %v637_v21 = vadd.f32 %v4253_v22, %v636_v30  ;;  %v3383_v31 = vpop.f32.mrb[30].mxu0 }
 0x11f   :  { %3401 = vmatmul.mubr.msk.bf16.gmra.mrb[24].mxu1 %vm352_vm1, %v672_v26  ;;  %v665_v32 = vmax.f32 %v645_v29, 0.0  ;;  %v648_v33 = vadd.f32 %v3383_v31, %v4253_v22  ;;  %v639_v34 = vpop.f32.mrb[31].mxu0 }
 0x120   :  { %v663_v35 = vmax.f32 %v637_v21, 0.0  ;;  %v640_v36 = vadd.f32 %v4253_v22, %v639_v34 }
 0x121   :  { %v666_v37 = vmax.f32 %v648_v33, 0.0 }
 0x122   :  { %v664_v38 = vmax.f32 %v640_v36, 0.0 }
 0x123   :  { %v674_v39 = vpack.c.bf16 %v666_v37, %v665_v32 }
 0x124   :  { %v673_v40 = vpack.c.bf16 %v664_v38, %v663_v35 }
 0x126   :  { %3404 = vmatprep.mubr.msk.bf16.mxu1 %vm352_vm1, %v673_v40 }
 0x127   :  { %3405 = vmatmul.mubr.msk.bf16.gmra.mrb[28].mxu1 %vm352_vm1, %v674_v39 }
 0x1c2   :  { %v3350_v42 = vpop.f32.mrb[0].mxu1 }
 0x1c3   :  { %v420_v43 = vadd.f32 %v3350_v42, %v4309_v41  ;;  %v411_v44 = vpop.f32.mrb[1].mxu1 }
 0x1c4   :  { %v412_v45 = vadd.f32 %v4309_v41, %v411_v44  ;;  %v3351_v22 = vpop.f32.mrb[2].mxu1 }
 0x1c5   :  { %v423_v46 = vadd.f32 %v3351_v22, %v4309_v41  ;;  %v414_v47 = vpop.f32.mrb[3].mxu1  ;;  %v476_v49 = vmax.f32 %v420_v43, 0.0 }
 0x1c6   :  { %v415_v48 = vadd.f32 %v4309_v41, %v414_v47  ;;  %v474_v51 = vmax.f32 %v412_v45, 0.0 }
 0x1c7   :  { %v477_v50 = vmax.f32 %v423_v46, 0.0 }
 0x1c8   :  { %v475_v52 = vmax.f32 %v415_v48, 0.0 }
 0x1c9   :  { %v4315_v53 = vpack.c.bf16 %v477_v50, %v476_v49 }
 0x1ca   :  { %v812_v54 = vpack.c.bf16 %v475_v52, %v474_v51  ;;  %v3354_v55 = vpop.f32.mrb[4].mxu1 }
 0x1cb   :  { %v436_v56 = vadd.f32 %v3354_v55, %v4309_v41  ;;  %v427_v57 = vpop.f32.mrb[5].mxu1  ;;  %v848_v29 = vsel %vm352_vm1, %v4315_v53, 0 }
 0x1cc   :  { %v428_v58 = vadd.f32 %v4309_v41, %v427_v57  ;;  %v3355_v59 = vpop.f32.mrb[6].mxu1  ;;  %3424 = vmatprep.mubr.msk.bf16.mxu0 %vm352_vm1, %v812_v54  ;;  %3792 = vmatprep.subr.msk.bf16.mxu1 %vm352_vm1, %v812_v54  ;;  %v845_v60 = vsel %vm352_vm1, %v812_v54, 0 }
 0x1cd   :  { %v439_v61 = vadd.f32 %v3355_v59, %v4309_v41  ;;  %v430_v62 = vpop.f32.mrb[7].mxu1  ;;  %3441 = vmatpush3.bf16.xpose.msra.mxu1 %v845_v60  ;;  %v480_v0 = vmax.f32 %v436_v56, 0.0 }
 0x1ce   :  { %v431_v63 = vadd.f32 %v4309_v41, %v430_v62  ;;  %3793 = vmatprep.subr.msk.bf16.mxu1 %vm352_vm1, %v4315_v53  ;;  %v478_v7 = vmax.f32 %v428_v58, 0.0 }
 0x1cf   :  { %v481_v1 = vmax.f32 %v439_v61, 0.0 }
 0x1d0   :  { %v479_v8 = vmax.f32 %v431_v63, 0.0 }
 0x1d1   :  { %v4326_v23 = vpack.c.bf16 %v481_v1, %v480_v0 }
 0x1d2   :  { %v4328_v24 = vpack.c.bf16 %v479_v8, %v478_v7  ;;  %v3358_v25 = vpop.f32.mrb[8].mxu1 }
 0x1d3   :  { %v452_v20 = vadd.f32 %v3358_v25, %v4309_v41  ;;  %v443_v26 = vpop.f32.mrb[9].mxu1  ;;  %v854_v59 = vsel %vm352_vm1, %v4326_v23, 0 }
 0x1d4   :  { %v444_v27 = vadd.f32 %v4309_v41, %v443_v26  ;;  %v3359_v28 = vpop.f32.mrb[10].mxu1  ;;  %v851_v44 = vsel %vm352_vm1, %v4328_v24, 0 }
 0x1d5   :  { %v455_v30 = vadd.f32 %v3359_v28, %v4309_v41  ;;  %v446_v21 = vpop.f32.mrb[11].mxu1  ;;  %3443 = vmatpush3.bf16.xpose.msra.mxu1 %v848_v29  ;;  %v484_v32 = vmax.f32 %v452_v20, 0.0 }
 0x1d6   :  { %v447_v31 = vadd.f32 %v4309_v41, %v446_v21  ;;  %3794 = vmatprep.subr.msk.bf16.mxu1 %vm352_vm1, %v4328_v24  ;;  %v482_v34 = vmax.f32 %v444_v27, 0.0 }
 0x1d7   :  { %v485_v33 = vmax.f32 %v455_v30, 0.0 }
 0x1d8   :  { %v483_v35 = vmax.f32 %v447_v31, 0.0 }
 0x1d9   :  { %v4338_v36 = vpack.c.bf16 %v485_v33, %v484_v32 }
 0x1da   :  { %v4340_v37 = vpack.c.bf16 %v483_v35, %v482_v34  ;;  %v3362_v38 = vpop.f32.mrb[12].mxu1 }
 0x1db   :  { %v468_v39 = vadd.f32 %v3362_v38, %v4309_v41  ;;  %v459_v40 = vpop.f32.mrb[13].mxu1 }
 0x1dc   :  { %v460_v42 = vadd.f32 %v4309_v41, %v459_v40  ;;  %v3363_v43 = vpop.f32.mrb[14].mxu1  ;;  %v857_v21 = vsel %vm352_vm1, %v4340_v37, 0 }
 0x1dd   :  { %v471_v45 = vadd.f32 %v3363_v43, %v4309_v41  ;;  %v462_v22 = vpop.f32.mrb[15].mxu1  ;;  %3445 = vmatpush3.bf16.xpose.msra.mxu1 %v851_v44  ;;  %v488_v47 = vmax.f32 %v468_v39, 0.0 }
 0x1de   :  { %v463_v46 = vadd.f32 %v4309_v41, %v462_v22  ;;  %3795 = vmatprep.subr.msk.bf16.mxu1 %vm352_vm1, %v4326_v23  ;;  %v486_v49 = vmax.f32 %v460_v42, 0.0 }
 0x1df   :  { %v489_v48 = vmax.f32 %v471_v45, 0.0 }
 0x1e0   :  { %v487_v50 = vmax.f32 %v463_v46, 0.0  ;;  %v860_v46 = vsel %vm352_vm1, %v4338_v36, 0 }
 0x1e1   :  { %v4350_v51 = vpack.c.bf16 %v489_v48, %v488_v47 }
 0x1e2   :  { %v4352_v52 = vpack.c.bf16 %v487_v50, %v486_v49  ;;  %v3394_v54 = vpop.f32.mrb[16].mxu1 }
 0x1e3   :  { %v742_v55 = vadd.f32 %v3394_v54, %v4309_v41  ;;  %v733_v56 = vpop.f32.mrb[17].mxu1 }
 0x1e4   :  { %v734_v57 = vadd.f32 %v4309_v41, %v733_v56  ;;  %v3395_v58 = vpop.f32.mrb[18].mxu1 }
 0x1e5   :  { %v745_v60 = vadd.f32 %v3395_v58, %v4309_v41  ;;  %v736_v61 = vpop.f32.mrb[19].mxu1  ;;  %3447 = vmatpush3.bf16.xpose.msra.mxu1 %v854_v59  ;;  %v798_v63 = vmax.f32 %v742_v55, 0.0 }
 0x1e6   :  { %v737_v62 = vadd.f32 %v4309_v41, %v736_v61  ;;  %3796 = vmatprep.subr.msk.bf16.mxu1 %vm352_vm1, %v4340_v37  ;;  %v796_v1 = vmax.f32 %v734_v57, 0.0 }
 0x1e7   :  { %v799_v0 = vmax.f32 %v745_v60, 0.0 }
 0x1e8   :  { %v797_v7 = vmax.f32 %v737_v62, 0.0 }
 0x1e9   :  { %v4362_v8 = vpack.c.bf16 %v799_v0, %v798_v63 }
 0x1ea   :  { %v820_v25 = vpack.c.bf16 %v797_v7, %v796_v1  ;;  %v3398_v20 = vpop.f32.mrb[20].mxu1  ;;  %v863_v1 = vsel %vm352_vm1, %v4352_v52, 0 }
 0x1eb   :  { %v758_v26 = vadd.f32 %v3398_v20, %v4309_v41  ;;  %v749_v27 = vpop.f32.mrb[21].mxu1  ;;  %v872_v22 = vsel %vm352_vm1, %v4362_v8, 0 }
 0x1ec   :  { %v750_v28 = vadd.f32 %v4309_v41, %v749_v27  ;;  %3784 = vmatprep.subr.msk.bf16.mxu0 %vm352_vm1, %v820_v25  ;;  %3456 = vmatprep.mubr.msk.bf16.mxu1 %vm352_vm1, %v820_v25  ;;  %v3399_v29 = vpop.f32.mrb[22].mxu1  ;;  %v869_v30 = vsel %vm352_vm1, %v820_v25, 0 }
 0x1ed   :  { %v802_v31 = vmax.f32 %v758_v26, 0.0  ;;  %v761_v32 = vadd.f32 %v3399_v29, %v4309_v41  ;;  %3409 = vmatpush3.bf16.xpose.msra.mxu0 %v869_v30  ;;  %3449 = vmatpush3.bf16.xpose.msra.mxu1 %v857_v21  ;;  %v752_v33 = vpop.f32.mrb[23].mxu1 }
 0x1ee   :  { %v800_v34 = vmax.f32 %v750_v28, 0.0  ;;  %v753_v35 = vadd.f32 %v4309_v41, %v752_v33  ;;  %3785 = vmatprep.subr.msk.bf16.mxu0 %vm352_vm1, %v4362_v8  ;;  %3797 = vmatprep.subr.msk.bf16.mxu1 %vm352_vm1, %v4338_v36 }
 0x1ef   :  { %v803_v38 = vmax.f32 %v761_v32, 0.0 }
 0x1f0   :  { %v801_v39 = vmax.f32 %v753_v35, 0.0 }
 0x1f1   :  { %v823_v40 = vpack.c.bf16 %v803_v38, %v802_v31  ;;  %v831_v38 = vld [vmem:[%s5327_s29 + $0x18] sm:$0xff] }
 0x1f2   :  { %v822_v42 = vpack.c.bf16 %v801_v39, %v800_v34  ;;  %v3402_v43 = vpop.f32.mrb[24].mxu1  ;;  %v866_v34 = vsel %vm352_vm1, %v4350_v51, 0 }
 0x1f3   :  { %v774_v44 = vadd.f32 %v3402_v43, %v4309_v41  ;;  %v765_v45 = vpop.f32.mrb[25].mxu1  ;;  %v878_v33 = vsel %vm352_vm1, %v823_v40, 0 }
 0x1f4   :  { %v766_v47 = vadd.f32 %v4309_v41, %v765_v45  ;;  %v3403_v48 = vpop.f32.mrb[26].mxu1  ;;  %v875_v0 = vsel %vm352_vm1, %v822_v42, 0  ;;  %v832_v45 = vld [vmem:[%s5327_s29 + $0x20] sm:$0xff] }
 0x1f5   :  { %3411 = vmatpush3.bf16.xpose.msra.mxu0 %v872_v22  ;;  %3451 = vmatpush3.bf16.xpose.msra.mxu1 %v860_v46  ;;  %v806_v49 = vmax.f32 %v774_v44, 0.0  ;;  %v777_v50 = vadd.f32 %v3403_v48, %v4309_v41  ;;  %v768_v54 = vpop.f32.mrb[27].mxu1 }
 0x1f6   :  { %3786 = vmatprep.subr.msk.bf16.mxu0 %vm352_vm1, %v822_v42  ;;  %3798 = vmatprep.subr.msk.bf16.mxu1 %vm352_vm1, %v4352_v52  ;;  %v804_v55 = vmax.f32 %v766_v47, 0.0  ;;  %v769_v56 = vadd.f32 %v4309_v41, %v768_v54  ;;  %v833_v47 = vld [vmem:[%s5327_s29 + $0x28] sm:$0xff] }
 0x1f7   :  { %v807_v57 = vmax.f32 %v777_v50, 0.0  ;;  %v834_v50 = vld [vmem:[%s5327_s29 + $0x30] sm:$0xff] }
 0x1f8   :  { %v805_v58 = vmax.f32 %v769_v56, 0.0  ;;  %v835_v56 = vld [vmem:[%s5327_s29 + $0x38] sm:$0xff] }
 0x1f9   :  { %v825_v59 = vpack.c.bf16 %v807_v57, %v806_v49 }
 0x1fa   :  { %v824_v60 = vpack.c.bf16 %v805_v58, %v804_v55  ;;  %v3406_v61 = vpop.f32.mrb[28].mxu1  ;;  %v836_v58 = vld [vmem:[%s5327_s29 + $0x40] sm:$0xff] }
 0x1fb   :  { %v790_v62 = vadd.f32 %v3406_v61, %v4309_v41  ;;  %v781_v63 = vpop.f32.mrb[29].mxu1  ;;  %v884_v35 = vsel %vm352_vm1, %v825_v59, 0 }
 0x1fc   :  { %v782_v7 = vadd.f32 %v4309_v41, %v781_v63  ;;  %v3407_v25 = vpop.f32.mrb[30].mxu1 }
 0x1fd   :  { %3413 = vmatpush3.bf16.xpose.msra.mxu0 %v875_v0  ;;  %3453 = vmatpush3.bf16.xpose.msra.mxu1 %v863_v1  ;;  %v810_v20 = vmax.f32 %v790_v62, 0.0  ;;  %v793_v26 = vadd.f32 %v3407_v25, %v4309_v41  ;;  %v784_v27 = vpop.f32.mrb[31].mxu1  ;;  %v837_v62 = vld [vmem:[%s5327_s29 + $0x48] sm:$0xff]  ;;  %v838_v1 = vld [vmem:[%s5327_s29 + $0x50] sm:$0xff] }
 0x1fe   :  { %3787 = vmatprep.subr.msk.bf16.mxu0 %vm352_vm1, %v823_v40  ;;  %3799 = vmatprep.subr.msk.bf16.mxu1 %vm352_vm1, %v4350_v51  ;;  %v808_v28 = vmax.f32 %v782_v7, 0.0  ;;  %v785_v29 = vadd.f32 %v4309_v41, %v784_v27  ;;  %v881_v41 = vsel %vm352_vm1, %v824_v60, 0  ;;  %v840_v27 = vld [vmem:[%s5327_s29 + $0x60] sm:$0xff] }
 0x1ff   :  { %v811_v30 = vmax.f32 %v793_v26, 0.0 }
 0x200   :  { %v809_v21 = vmax.f32 %v785_v29, 0.0 }
 0x201   :  { %v827_v31 = vpack.c.bf16 %v811_v30, %v810_v20  ;;  %v839_v20 = vld [vmem:[%s5327_s29 + $0x58] sm:$0xff] }
 0x202   :  { %v826_v32 = vpack.c.bf16 %v809_v21, %v808_v28  ;;  %v841_v21 = vld [vmem:[%s5327_s29 + $0x68] sm:$0xff] }
 0x205   :  { %3415 = vmatpush3.bf16.xpose.msra.mxu0 %v878_v33  ;;  %3455 = vmatpush3.bf16.xpose.msra.mxu1 %v866_v34  ;;  %v842_v33 = vld [vmem:[%s5327_s29 + $0x70] sm:$0xff] }
 0x206   :  { %3788 = vmatprep.subr.msk.bf16.mxu0 %vm352_vm1, %v824_v60  ;;  %3504 = vmatprep.subr.bf16.mxu1 %v4120_v2 }
 0x20c   :  { %3457 = vmatmul.mubr.msk.bf16.vlgmr.msra.gmra.mrb[32].mxu1 %vm352_vm1, %v4362_v8 }
 0x20d   :  { %3417 = vmatpush3.bf16.xpose.msra.mxu0 %v881_v41  ;;  %3460 = vmatprep.mubr.msk.bf16.mxu1 %vm352_vm1, %v822_v42  ;;  %v829_v42 = vld [vmem:[%s5327_s29 + $0x8] sm:$0xff] }
 0x20e   :  { %3789 = vmatprep.subr.msk.bf16.mxu0 %vm352_vm1, %v825_v59  ;;  %3505 = vmatpush3.bf16.msra.mxu1 %v4120_v2  ;;  %v887_v2 = vsel %vm352_vm1, %v826_v32, 0 }
 0x20f   :  { %3506 = vmatprep.subr.bf16.mxu1 %v4127_v3 }
 0x212   :  { %3507 = vmatpush3.bf16.msra.mxu1 %v4127_v3  ;;  %v890_v3 = vsel %vm352_vm1, %v827_v31, 0 }
 0x213   :  { %3508 = vmatprep.subr.bf16.mxu1 %v4132_v4 }
 0x214   :  { %3461 = vmatmul.mubr.msk.bf16.gmra.mrb[36].mxu1 %vm352_vm1, %v823_v40 }
 0x215   :  { %3419 = vmatpush3.bf16.xpose.msra.mxu0 %v884_v35  ;;  %3464 = vmatprep.mubr.msk.bf16.mxu1 %vm352_vm1, %v824_v60  ;;  %v843_v35 = vld [vmem:[%s5327_s29 + $0x78] sm:$0xff] }
 0x216   :  { %3790 = vmatprep.subr.msk.bf16.mxu0 %vm352_vm1, %v826_v32  ;;  %3509 = vmatpush3.bf16.msra.mxu1 %v4132_v4 }
 0x217   :  { %3510 = vmatprep.subr.bf16.mxu1 %v4141_v5 }
 0x21a   :  { %3511 = vmatpush3.bf16.msra.mxu1 %v4141_v5 }
 0x21b   :  { %3512 = vmatprep.subr.bf16.mxu1 %v4146_v6 }
 0x21c   :  { %3465 = vmatmul.mubr.msk.bf16.gmra.mrb[40].mxu1 %vm352_vm1, %v825_v59 }
 0x21d   :  { %3421 = vmatpush3.bf16.xpose.msra.mxu0 %v887_v2  ;;  %3468 = vmatprep.mubr.msk.bf16.mxu1 %vm352_vm1, %v826_v32 }
 0x21e   :  { %3791 = vmatprep.subr.msk.bf16.mxu0 %vm352_vm1, %v827_v31  ;;  %3513 = vmatpush3.bf16.msra.mxu1 %v4146_v6 }
 0x21f   :  { %3514 = vmatprep.subr.bf16.mxu1 %v4167_v9 }
 0x222   :  { %3515 = vmatpush3.bf16.msra.mxu1 %v4167_v9 }
 0x223   :  { %3516 = vmatprep.subr.bf16.mxu1 %v4173_v10 }
 0x224   :  { %3469 = vmatmul.mubr.msk.bf16.gmra.mrb[44].mxu1 %vm352_vm1, %v827_v31 }
 0x225   :  { %3423 = vmatpush3.bf16.xpose.msra.mxu0 %v890_v3 }
 0x226   :  { %3472 = vmatprep.subr.bf16.mxu0 %v4188_v12  ;;  %3517 = vmatpush3.bf16.msra.mxu1 %v4173_v10 }
 0x227   :  { %3518 = vmatprep.subr.bf16.mxu1 %v4183_v11 }
 0x22a   :  { %3519 = vmatpush3.bf16.msra.mxu1 %v4183_v11 }
 0x22c   :  { %3425 = vmatmul.mubr.msk.bf16.vlgmr.msra.gmra.mrb[32].mxu0 %vm352_vm1, %v4315_v53 }
 0x22d   :  { %3428 = vmatprep.mubr.msk.bf16.mxu0 %vm352_vm1, %v4328_v24  ;;  %3473 = vmatpush3.bf16.msra.mxu0 %v4188_v12  ;;  %v830_v24 = vld [vmem:[%s5327_s29 + $0x10] sm:$0xff] }
 0x22e   :  { %3474 = vmatprep.subr.bf16.mxu0 %v4197_v13 }
 0x231   :  { %3475 = vmatpush3.bf16.msra.mxu0 %v4197_v13 }
 0x232   :  { %3476 = vmatprep.subr.bf16.mxu0 %v4202_v14 }
 0x234   :  { %3429 = vmatmul.mubr.msk.bf16.gmra.mrb[36].mxu0 %vm352_vm1, %v4326_v23 }
 0x235   :  { %3432 = vmatprep.mubr.msk.bf16.mxu0 %vm352_vm1, %v4340_v37  ;;  %3477 = vmatpush3.bf16.msra.mxu0 %v4202_v14 }
 0x236   :  { %3478 = vmatprep.subr.bf16.mxu0 %v4211_v15 }
 0x239   :  { %3479 = vmatpush3.bf16.msra.mxu0 %v4211_v15 }
 0x23a   :  { %3480 = vmatprep.subr.bf16.mxu0 %v4216_v16 }
 0x23c   :  { %3433 = vmatmul.mubr.msk.bf16.gmra.mrb[40].mxu0 %vm352_vm1, %v4338_v36  ;;  %v828_v36 = vld [vmem:[%s5327_s29] sm:$0xff] }
 0x23d   :  { %3436 = vmatprep.mubr.msk.bf16.mxu0 %vm352_vm1, %v4352_v52  ;;  %3481 = vmatpush3.bf16.msra.mxu0 %v4216_v16 }
 0x23e   :  { %3482 = vmatprep.subr.bf16.mxu0 %v4225_v17 }
 0x241   :  { %3483 = vmatpush3.bf16.msra.mxu0 %v4225_v17 }
 0x242   :  { %3484 = vmatprep.subr.bf16.mxu0 %v4230_v18 }
 0x244   :  { %3437 = vmatmul.mubr.msk.bf16.gmra.mrb[44].mxu0 %vm352_vm1, %v4350_v51 }
 0x245   :  { %3485 = vmatpush3.bf16.msra.mxu0 %v4230_v18 }
 0x246   :  { %3486 = vmatprep.subr.bf16.mxu0 %v4239_v19 }
 0x249   :  { %3487 = vmatpush3.bf16.msra.mxu0 %v4239_v19 }
 0x2df   :  { %v4463_v4 = vpop.f32.mrb[32].mxu1 }
 0x2e0   :  { %v4465_v5 = vpop.f32.mrb[33].mxu1 }
 0x2e1   :  { %v4467_v6 = vpop.f32.mrb[34].mxu1 }
 0x2e2   :  { %v4469_v9 = vpop.f32.mrb[35].mxu1 }
 0x2e7   :  { %v4471_v10 = vpop.f32.mrb[36].mxu1 }
 0x2e8   :  { %v4473_v11 = vpop.f32.mrb[37].mxu1 }
 0x2e9   :  { %v4475_v12 = vpop.f32.mrb[38].mxu1 }
 0x2ea   :  { %v4477_v13 = vpop.f32.mrb[39].mxu1 }
 0x2ef   :  { %v4479_v14 = vpop.f32.mrb[40].mxu1 }
 0x2f0   :  { %v4481_v15 = vpop.f32.mrb[41].mxu1 }
 0x2f1   :  { %v4483_v16 = vpop.f32.mrb[42].mxu1 }
 0x2f2   :  { %v4485_v17 = vpop.f32.mrb[43].mxu1 }
 0x2f7   :  { %v4487_v18 = vpop.f32.mrb[44].mxu1 }
 0x2f8   :  { %v4489_v19 = vpop.f32.mrb[45].mxu1 }
 0x2f9   :  { %v4491_v53 = vpop.f32.mrb[46].mxu1 }
 0x2fa   :  { %v4493_v23 = vpop.f32.mrb[47].mxu1 }
 0x2ff   :  { %v3426_v37 = vpop.f32.mrb[32].mxu0 }
 0x300   :  { %v4501_v51 = vadd.f32 %v3426_v37, %v830_v24  ;;  %v926_v52 = vpop.f32.mrb[33].mxu0 }
 0x301   :  { %v4503_v8 = vadd.f32 %v926_v52, %v828_v36  ;;  %v3427_v39 = vpop.f32.mrb[34].mxu0 }
 0x302   :  { %1106 = vmax.xlane.f32.xlu1 %v4501_v51  ;;  %v929_v40 = vpop.f32.mrb[35].mxu0  ;;  %v4513_v43 = vadd.f32 %v3427_v39, %v831_v38 }
 0x303   :  { %1102 = vmax.xlane.f32.xlu0 %v4503_v8  ;;  %v930_v44 = vadd.f32 %v929_v40, %v829_v42 }
 0x306   :  { %1108 = vmax.xlane.f32.xlu1 %v4513_v43 }
 0x307   :  { %v3430_v22 = vpop.f32.mrb[36].mxu0  ;;  %1104 = vmax.xlane.f32.xlu0 %v930_v44 }
 0x308   :  { %v942_v46 = vpop.f32.mrb[37].mxu0  ;;  %v4530_v57 = vadd.f32 %v3430_v22, %v834_v50 }
 0x309   :  { %v943_v48 = vadd.f32 %v942_v46, %v832_v45  ;;  %v3431_v49 = vpop.f32.mrb[38].mxu0 }
 0x30a   :  { %v945_v54 = vpop.f32.mrb[39].mxu0  ;;  %v4536_v59 = vadd.f32 %v3431_v49, %v835_v56 }
 0x30b   :  { %v4525_v55 = vadd.f32 %v945_v54, %v833_v47  ;;  %1110 = vmax.xlane.f32.xlu0 %v943_v48 }
 0x30d   :  { %1112 = vmax.xlane.f32.xlu1 %v4525_v55 }
 0x30f   :  { %v3434_v60 = vpop.f32.mrb[40].mxu0  ;;  %1114 = vmax.xlane.f32.xlu0 %v4530_v57 }
 0x310   :  { %v958_v61 = vpop.f32.mrb[41].mxu0  ;;  %v4554_v26 = vadd.f32 %v3434_v60, %v838_v1 }
 0x311   :  { %v4542_v63 = vadd.f32 %v958_v61, %v836_v58  ;;  %v3435_v0 = vpop.f32.mrb[42].mxu0  ;;  %1116 = vmax.xlane.f32.xlu1 %v4536_v59 }
 0x312   :  { %v961_v7 = vpop.f32.mrb[43].mxu0  ;;  %v4560_v28 = vadd.f32 %v3435_v0, %v839_v20 }
 0x313   :  { %v4548_v25 = vadd.f32 %v961_v7, %v837_v62  ;;  %1118 = vmax.xlane.f32.xlu0 %v4542_v63 }
 0x315   :  { %1120 = vmax.xlane.f32.xlu1 %v4548_v25 }
 0x317   :  { %v3438_v29 = vpop.f32.mrb[44].mxu0  ;;  %1122 = vmax.xlane.f32.xlu0 %v4554_v26 }
 0x318   :  { %v974_v30 = vpop.f32.mrb[45].mxu0  ;;  %v4578_v2 = vadd.f32 %v3438_v29, %v842_v33 }
 0x319   :  { %v4566_v31 = vadd.f32 %v974_v30, %v840_v27  ;;  %v3439_v32 = vpop.f32.mrb[46].mxu0  ;;  %1124 = vmax.xlane.f32.xlu1 %v4560_v28 }
 0x31a   :  { %v977_v34 = vpop.f32.mrb[47].mxu0  ;;  %v4581_v3 = vadd.f32 %v3439_v32, %v843_v35 }
 0x31b   :  { %v4572_v41 = vadd.f32 %v977_v34, %v841_v21  ;;  %1126 = vmax.xlane.f32.xlu0 %v4566_v31 }
 0x31d   :  { %1128 = vmax.xlane.f32.xlu1 %v4572_v41 }
 0x31f   :  { %1130 = vmax.xlane.f32.xlu0 %v4578_v2 }
 0x321   :  { %1132 = vmax.xlane.f32.xlu1 %v4581_v3 }
 0x38f   :  { %v1107_v24 = vpop.xlane.xlu1 %1106 }
 0x390   :  { %v1136_v36 = vsub.f32 %v4501_v51, %v1107_v24  ;;  %v1103_v37 = vpop.xlane.xlu0 %1102 }
 0x391   :  { %v1134_v52 = vsub.f32 %v4503_v8, %v1103_v37 }
 0x392   :  { %v1154_v40 = vmul.f32 1.442695, %v1136_v36 }
 0x393   :  { %v1150_v38 = vmul.f32 1.442695, %v1134_v52  ;;  %v1109_v39 = vpop.xlane.xlu1 %1108 }
 0x394   :  { %v1137_v42 = vsub.f32 %v4513_v43, %v1109_v39  ;;  %v1105_v45 = vpop.xlane.xlu0 %1104 }
 0x395   :  { %3850 = vpow2.f32 %v1150_v38  ;;  %v1135_v22 = vsub.f32 %v930_v44, %v1105_v45 }
 0x396   :  { %3852 = vpow2.f32 %v1154_v40  ;;  %v1156_v47 = vmul.f32 1.442695, %v1137_v42 }
 0x397   :  { %v1152_v46 = vmul.f32 1.442695, %v1135_v22 }
 0x398   :  { %v1111_v49 = vpop.xlane.xlu0 %1110 }
 0x399   :  { %3854 = vpow2.f32 %v1152_v46  ;;  %v1138_v50 = vsub.f32 %v943_v48, %v1111_v49 }
 0x39a   :  { %v1113_v54 = vpop.xlane.xlu1 %1112  ;;  %3856 = vpow2.f32 %v1156_v47 }
 0x39b   :  { %v1158_v56 = vmul.f32 1.442695, %v1138_v50  ;;  %v1139_v51 = vsub.f32 %v4525_v55, %v1113_v54 }
 0x39c   :  { %v1115_v8 = vpop.xlane.xlu0 %1114 }
 0x39d   :  { %3858 = vpow2.f32 %v1158_v56  ;;  %v1160_v58 = vmul.f32 1.442695, %v1139_v51  ;;  %v1140_v60 = vsub.f32 %v4530_v57, %v1115_v8  ;;  %v989_v56 = vld [vmem:[%s5293_s3] sm:$0xff] }
 0x39e   :  { %v1117_v43 = vpop.xlane.xlu1 %1116  ;;  %v4648_v51 = vadd.f32 %v4465_v5, %v989_v56 }
 0x39f   :  { %v4590_v61 = vpop.eup %3850  ;;  %v1162_v44 = vmul.f32 1.442695, %v1140_v60  ;;  %v1141_v62 = vsub.f32 %v4536_v59, %v1117_v43  ;;  %3860 = vpow2.f32 %v1160_v58  ;;  %v991_v58 = vld [vmem:[%s5293_s3 + $0x10] sm:$0xff]  ;;  %v990_v60 = vld [vmem:[%s5293_s3 + $0x8] sm:$0xff] }
 0x3a0   :  { %1182 = vadd.xlane.f32.xlu0 %v4590_v61  ;;  %v1119_v48 = vpop.xlane.xlu0 %1118  ;;  %v4595_v1 = vpop.eup %3852  ;;  %v4661_v43 = vadd.f32 %v4463_v4, %v991_v58  ;;  %v4664_v5 = vadd.f32 %v4469_v9, %v990_v60  ;;  %v995_v9 = vld [vmem:[%s5293_s3 + $0x30] sm:$0xff] }
 0x3a1   :  { %3862 = vpow2.f32 %v1162_v44  ;;  %v1164_v0 = vmul.f32 1.442695, %v1141_v62  ;;  %v1142_v55 = vsub.f32 %v4542_v63, %v1119_v48  ;;  %v992_v44 = vld [vmem:[%s5293_s3 + $0x18] sm:$0xff]  ;;  %v993_v62 = vld [vmem:[%s5293_s3 + $0x20] sm:$0xff] }
 0x3a2   :  { %v1121_v7 = vpop.xlane.xlu1 %1120  ;;  %v4675_v48 = vadd.f32 %v4467_v6, %v992_v44  ;;  %v4678_v4 = vadd.f32 %v4473_v11, %v993_v62  ;;  %v996_v11 = vld [vmem:[%s5293_s3 + $0x38] sm:$0xff] }
 0x3a3   :  { %v4597_v20 = vpop.eup %3854  ;;  %v1166_v57 = vmul.f32 1.442695, %v1142_v55  ;;  %v1143_v27 = vsub.f32 %v4548_v25, %v1121_v7  ;;  %3864 = vpow2.f32 %v1164_v0  ;;  %v994_v0 = vld [vmem:[%s5293_s3 + $0x28] sm:$0xff]  ;;  %v4689_v55 = vadd.f32 %v4471_v10, %v995_v9  ;;  %v997_v7 = vld [vmem:[%s5293_s3 + $0x40] sm:$0xff] }
 0x3a4   :  { %1186 = vadd.xlane.f32.xlu0 %v4595_v1  ;;  %1184 = vadd.xlane.f32.xlu1 %v4597_v20  ;;  %v1123_v59 = vpop.xlane.xlu0 %1122  ;;  %v4603_v21 = vpop.eup %3856  ;;  %v4692_v6 = vadd.f32 %v4477_v13, %v994_v0  ;;  %v4706_v10 = vadd.f32 %v4481_v15, %v997_v7  ;;  %v999_v13 = vld [vmem:[%s5293_s3 + $0x50] sm:$0xff]  ;;  %v1000_v15 = vld [vmem:[%s5293_s3 + $0x58] sm:$0xff] }
 0x3a5   :  { %3866 = vpow2.f32 %v1166_v57  ;;  %v1168_v29 = vmul.f32 1.442695, %v1143_v27  ;;  %v1144_v30 = vsub.f32 %v4554_v26, %v1123_v59  ;;  %v4703_v57 = vadd.f32 %v4475_v12, %v996_v11  ;;  %v998_v27 = vld [vmem:[%s5293_s3 + $0x48] sm:$0xff] }
 0x3a6   :  { %v1125_v63 = vpop.xlane.xlu1 %1124  ;;  %v4717_v59 = vadd.f32 %v4479_v14, %v999_v13  ;;  %v4720_v12 = vadd.f32 %v4485_v17, %v998_v27  ;;  %v1003_v17 = vld [vmem:[%s5293_s3 + $0x70] sm:$0xff] }
 0x3a7   :  { %v4605_v32 = vpop.eup %3858  ;;  %v1170_v33 = vmul.f32 1.442695, %v1144_v30  ;;  %v1145_v34 = vsub.f32 %v4560_v28, %v1125_v63  ;;  %3868 = vpow2.f32 %v1168_v29  ;;  %v1001_v29 = vld [vmem:[%s5293_s3 + $0x60] sm:$0xff]  ;;  %v4731_v30 = vadd.f32 %v4483_v16, %v1000_v15  ;;  %v1002_v63 = vld [vmem:[%s5293_s3 + $0x68] sm:$0xff] }
 0x3a8   :  { %1188 = vadd.xlane.f32.xlu1 %v4603_v21  ;;  %1190 = vadd.xlane.f32.xlu0 %v4605_v32  ;;  %v1127_v25 = vpop.xlane.xlu0 %1126  ;;  %v4734_v14 = vadd.f32 %v4489_v19, %v1001_v29  ;;  %v4748_v16 = vadd.f32 %v4493_v23, %v1002_v63  ;;  %v1004_v19 = vld [vmem:[%s5293_s3 + $0x78] sm:$0xff] }
 0x3a9   :  { %3870 = vpow2.f32 %v1170_v33  ;;  %v1172_v35 = vmul.f32 1.442695, %v1145_v34  ;;  %v1146_v24 = vsub.f32 %v4566_v31, %v1127_v25  ;;  %v4611_v36 = vpop.eup %3860  ;;  %v4745_v33 = vadd.f32 %v4487_v18, %v1003_v17 }
 0x3aa   :  { %v1129_v26 = vpop.xlane.xlu1 %1128  ;;  %v4756_v34 = vadd.f32 %v4491_v53, %v1004_v19 }
 0x3ab   :  { %v4613_v37 = vpop.eup %3862  ;;  %v1174_v52 = vmul.f32 1.442695, %v1146_v24  ;;  %v1147_v38 = vsub.f32 %v4572_v41, %v1129_v26  ;;  %3872 = vpow2.f32 %v1172_v35 }
 0x3ac   :  { %1192 = vadd.xlane.f32.xlu1 %v4611_v36  ;;  %1194 = vadd.xlane.f32.xlu0 %v4613_v37  ;;  %v1131_v28 = vpop.xlane.xlu0 %1130 }
 0x3ad   :  { %3874 = vpow2.f32 %v1174_v52  ;;  %v1176_v39 = vmul.f32 1.442695, %v1147_v38  ;;  %v1148_v40 = vsub.f32 %v4578_v2, %v1131_v28  ;;  %v4619_v42 = vpop.eup %3864 }
 0x3ae   :  { %v1133_v31 = vpop.xlane.xlu1 %1132 }
 0x3af   :  { %v4621_v45 = vpop.eup %3866  ;;  %v1178_v22 = vmul.f32 1.442695, %v1148_v40  ;;  %v1149_v46 = vsub.f32 %v4581_v3, %v1133_v31  ;;  %3876 = vpow2.f32 %v1176_v39 }
 0x3b0   :  { %1196 = vadd.xlane.f32.xlu1 %v4619_v42  ;;  %1198 = vadd.xlane.f32.xlu0 %v4621_v45 }
 0x3b1   :  { %3878 = vpow2.f32 %v1178_v22  ;;  %v1180_v41 = vmul.f32 1.442695, %v1149_v46  ;;  %v4626_v47 = vpop.eup %3868 }
 0x3b3   :  { %v4628_v49 = vpop.eup %3870  ;;  %3880 = vpow2.f32 %v1180_v41 }
 0x3b4   :  { %1200 = vadd.xlane.f32.xlu1 %v4626_v47  ;;  %1202 = vadd.xlane.f32.xlu0 %v4628_v49 }
 0x3b5   :  { %v4632_v2 = vpop.eup %3872 }
 0x3b7   :  { %v4634_v50 = vpop.eup %3874 }
 0x3b8   :  { %1204 = vadd.xlane.f32.xlu1 %v4632_v2  ;;  %1206 = vadd.xlane.f32.xlu0 %v4634_v50 }
 0x3b9   :  { %v4638_v3 = vpop.eup %3876 }
 0x3bb   :  { %v4640_v54 = vpop.eup %3878 }
 0x3bc   :  { %1208 = vadd.xlane.f32.xlu1 %v4638_v3  ;;  %1210 = vadd.xlane.f32.xlu0 %v4640_v54 }
 0x3bd   :  { %v4650_v8 = vpop.eup %3880 }
 0x3c0   :  { %1212 = vadd.xlane.f32.xlu1 %v4650_v8  ;;  %1359 = vmax.xlane.f32.xlu0 %v4648_v51 }
 0x3c4   :  { %1361 = vmax.xlane.f32.xlu1 %v4664_v5  ;;  %1363 = vmax.xlane.f32.xlu0 %v4661_v43 }
 0x3c8   :  { %1365 = vmax.xlane.f32.xlu1 %v4675_v48  ;;  %1367 = vmax.xlane.f32.xlu0 %v4678_v4 }
 0x3cc   :  { %1369 = vmax.xlane.f32.xlu1 %v4692_v6  ;;  %1371 = vmax.xlane.f32.xlu0 %v4689_v55 }
 0x3d0   :  { %1373 = vmax.xlane.f32.xlu1 %v4703_v57  ;;  %1375 = vmax.xlane.f32.xlu0 %v4706_v10 }
 0x3d4   :  { %1377 = vmax.xlane.f32.xlu1 %v4720_v12  ;;  %1379 = vmax.xlane.f32.xlu0 %v4717_v59 }
 0x3d8   :  { %1381 = vmax.xlane.f32.xlu1 %v4731_v30  ;;  %1383 = vmax.xlane.f32.xlu0 %v4734_v14 }
 0x3dc   :  { %1385 = vmax.xlane.f32.xlu1 %v4748_v16  ;;  %1387 = vmax.xlane.f32.xlu0 %v4745_v33 }
 0x3e0   :  { %1389 = vmax.xlane.f32.xlu1 %v4756_v34 }
 0x42d   :  { %v1183_v25 = vpop.xlane.xlu0 %1182 }
 0x42e   :  { %3882 = vrcp.f32 %v1183_v25 }
 0x431   :  { %v1185_v18 = vpop.xlane.xlu1 %1184  ;;  %v1187_v35 = vpop.xlane.xlu0 %1186 }
 0x432   :  { %3884 = vrcp.f32 %v1185_v18 }
 0x433   :  { %3886 = vrcp.f32 %v1187_v35 }
 0x435   :  { %v1189_v23 = vpop.xlane.xlu1 %1188  ;;  %v1191_v24 = vpop.xlane.xlu0 %1190 }
 0x436   :  { %3888 = vrcp.f32 %v1189_v23 }
 0x437   :  { %3890 = vrcp.f32 %v1191_v24 }
 0x438   :  { %v3883_v38 = vpop.eup %3882 }
 0x439   :  { %v1193_v26 = vpop.xlane.xlu1 %1192  ;;  %v1195_v52 = vpop.xlane.xlu0 %1194  ;;  %v1230_v40 = vmul.f32 %v3883_v38, %v4590_v61 }
 0x43a   :  { %3892 = vrcp.f32 %v1193_v26 }
 0x43b   :  { %3894 = vrcp.f32 %v1195_v52 }
 0x43c   :  { %v3885_v28 = vpop.eup %3884 }
 0x43d   :  { %v1197_v53 = vpop.xlane.xlu1 %1196  ;;  %v1199_v39 = vpop.xlane.xlu0 %1198  ;;  %v1231_v31 = vmul.f32 %v3885_v28, %v4597_v20 }
 0x43e   :  { %v3887_v22 = vpop.eup %3886  ;;  %3896 = vrcp.f32 %v1197_v53 }
 0x43f   :  { %v1246_v46 = vpack.c.bf16 %v1231_v31, %v1230_v40  ;;  %3898 = vrcp.f32 %v1199_v39  ;;  %v1232_v56 = vmul.f32 %v3887_v22, %v4595_v1 }
 0x440   :  { %v3889_v41 = vpop.eup %3888 }
 0x441   :  { %v1233_v58 = vmul.f32 %v3889_v41, %v4603_v21  ;;  %v1201_v60 = vpop.xlane.xlu1 %1200  ;;  %3488 = vmatprep.mubr.bf16.mxu0 %v1246_v46  ;;  %v1203_v44 = vpop.xlane.xlu0 %1202 }
 0x442   :  { %v3891_v62 = vpop.eup %3890  ;;  %3900 = vrcp.f32 %v1201_v60 }
 0x443   :  { %v1247_v9 = vpack.c.bf16 %v1233_v58, %v1232_v56  ;;  %3902 = vrcp.f32 %v1203_v44  ;;  %v1234_v11 = vmul.f32 %v3891_v62, %v4605_v32 }
 0x444   :  { %v3893_v0 = vpop.eup %3892 }
 0x445   :  { %v1205_v61 = vpop.xlane.xlu1 %1204  ;;  %3489 = vmatmul.mubr.bf16.vlgmr.msra.gmra.mrb[48].mxu0 %v1247_v9  ;;  %v1207_v20 = vpop.xlane.xlu0 %1206  ;;  %v1235_v7 = vmul.f32 %v3893_v0, %v4611_v36 }
 0x446   :  { %v3895_v13 = vpop.eup %3894  ;;  %3904 = vrcp.f32 %v1205_v61 }
 0x447   :  { %v1248_v1 = vpack.c.bf16 %v1235_v7, %v1234_v11  ;;  %3906 = vrcp.f32 %v1207_v20  ;;  %v1236_v29 = vmul.f32 %v3895_v13, %v4613_v37 }
 0x448   :  { %v3897_v27 = vpop.eup %3896 }
 0x449   :  { %v1209_v21 = vpop.xlane.xlu1 %1208  ;;  %3492 = vmatprep.mubr.bf16.mxu0 %v1248_v1  ;;  %v1211_v15 = vpop.xlane.xlu0 %1210  ;;  %v1237_v17 = vmul.f32 %v3897_v27, %v4619_v42 }
 0x44a   :  { %v3899_v63 = vpop.eup %3898  ;;  %3908 = vrcp.f32 %v1209_v21 }
 0x44b   :  { %v1249_v19 = vpack.c.bf16 %v1237_v17, %v1236_v29  ;;  %3910 = vrcp.f32 %v1211_v15  ;;  %v1238_v18 = vmul.f32 %v3899_v63, %v4621_v45 }
 0x44c   :  { %v3901_v25 = vpop.eup %3900 }
 0x44d   :  { %v1213_v32 = vpop.xlane.xlu1 %1212  ;;  %3493 = vmatmul.mubr.bf16.gmra.mrb[52].mxu0 %v1249_v19  ;;  %v1360_v36 = vpop.xlane.xlu0 %1359  ;;  %v1239_v35 = vmul.f32 %v3901_v25, %v4626_v47 }
 0x44e   :  { %v3903_v23 = vpop.eup %3902  ;;  %3912 = vrcp.f32 %v1213_v32  ;;  %v1391_v24 = vsub.f32 %v4648_v51, %v1360_v36 }
 0x44f   :  { %v1250_v26 = vpack.c.bf16 %v1239_v35, %v1238_v18  ;;  %v1240_v28 = vmul.f32 %v3903_v23, %v4628_v49 }
 0x450   :  { %v3905_v37 = vpop.eup %3904  ;;  %v1407_v52 = vmul.f32 1.442695, %v1391_v24 }
 0x451   :  { %3496 = vmatprep.mubr.bf16.mxu0 %v1250_v26  ;;  %v1362_v42 = vpop.xlane.xlu1 %1361  ;;  %v1364_v38 = vpop.xlane.xlu0 %1363  ;;  %v1241_v53 = vmul.f32 %v3905_v37, %v4632_v2 }
 0x452   :  { %v3907_v39 = vpop.eup %3906  ;;  %3914 = vpow2.f32 %v1407_v52  ;;  %v1392_v45 = vsub.f32 %v4664_v5, %v1362_v42  ;;  %v1393_v47 = vsub.f32 %v4661_v43, %v1364_v38 }
 0x453   :  { %v1251_v40 = vpack.c.bf16 %v1241_v53, %v1240_v28  ;;  %v1242_v56 = vmul.f32 %v3907_v39, %v4634_v50 }
 0x454   :  { %v3909_v31 = vpop.eup %3908  ;;  %v1409_v22 = vmul.f32 1.442695, %v1392_v45  ;;  %v1411_v51 = vmul.f32 1.442695, %v1393_v47 }
 0x455   :  { %3497 = vmatmul.mubr.bf16.gmra.mrb[56].mxu0 %v1251_v40  ;;  %v1366_v46 = vpop.xlane.xlu1 %1365  ;;  %v1368_v41 = vpop.xlane.xlu0 %1367  ;;  %v1243_v58 = vmul.f32 %v3909_v31, %v4638_v3 }
 0x456   :  { %v3911_v49 = vpop.eup %3910  ;;  %3916 = vpow2.f32 %v1409_v22  ;;  %v1394_v2 = vsub.f32 %v4675_v48, %v1366_v46  ;;  %v1395_v60 = vsub.f32 %v4678_v4, %v1368_v41  ;;  %v4849_v46 = vld [vmem:[%s5294_s11 + $0x8] sm:$0xff]   ;;  %v4856_v41 = vld [vmem:[%s5295_s10] sm:$0xff]  }
 0x457   :  { %3918 = vpow2.f32 %v1411_v51  ;;  %v1252_v5 = vpack.c.bf16 %v1243_v58, %v1242_v56  ;;  %v1244_v61 = vmul.f32 %v3911_v49, %v4640_v54  ;;  %v4842_v51 = vld [vmem:[%s5294_s11] sm:$0xff]  }
 0x458   :  { %v3913_v43 = vpop.eup %3912  ;;  %v1413_v44 = vmul.f32 1.442695, %v1394_v2  ;;  %v1415_v62 = vmul.f32 1.442695, %v1395_v60  ;;  %3536 = vmatprep.subr.bf16.mxu0 %v4842_v51 }
 0x459   :  { %3500 = vmatprep.mubr.bf16.mxu0 %v1252_v5  ;;  %v1370_v9 = vpop.xlane.xlu1 %1369  ;;  %v1372_v0 = vpop.xlane.xlu0 %1371  ;;  %v1245_v50 = vmul.f32 %v3913_v43, %v4650_v8  ;;  %3537 = vmatpush3.bf16.msra.mxu0 %v4842_v51 }
 0x45a   :  { %3920 = vpow2.f32 %v1413_v44  ;;  %v1396_v3 = vsub.f32 %v4692_v6, %v1370_v9  ;;  %v1397_v20 = vsub.f32 %v4689_v55, %v1372_v0  ;;  %3538 = vmatprep.subr.bf16.mxu0 %v4849_v46 }
 0x45b   :  { %3922 = vpow2.f32 %v1415_v62  ;;  %v1253_v48 = vpack.c.bf16 %v1245_v50, %v1244_v61 }
 0x45c   :  { %v4782_v4 = vpop.eup %3914  ;;  %v1417_v11 = vmul.f32 1.442695, %v1396_v3  ;;  %v1419_v7 = vmul.f32 1.442695, %v1397_v20 }
 0x45d   :  { %3501 = vmatmul.mubr.bf16.gmra.mrb[60].mxu0 %v1253_v48  ;;  %v1374_v13 = vpop.xlane.xlu1 %1373  ;;  %1439 = vadd.xlane.f32.xlu0 %v4782_v4  ;;  %v1376_v1 = vpop.xlane.xlu0 %1375 }
 0x45e   :  { %3924 = vpow2.f32 %v1417_v11  ;;  %v1398_v54 = vsub.f32 %v4703_v57, %v1374_v13  ;;  %v1399_v8 = vsub.f32 %v4706_v10, %v1376_v1  ;;  %3539 = vmatpush3.bf16.msra.mxu0 %v4849_v46 }
 0x45f   :  { %3926 = vpow2.f32 %v1419_v7  ;;  %3556 = vmatprep.subr.bf16.mxu0 %v4856_v41 }
 0x460   :  { %v4787_v6 = vpop.eup %3916  ;;  %v1421_v55 = vmul.f32 1.442695, %v1398_v54  ;;  %v1423_v27 = vmul.f32 1.442695, %v1399_v8 }
 0x461   :  { %v4789_v21 = vpop.eup %3918  ;;  %1441 = vadd.xlane.f32.xlu1 %v4787_v6  ;;  %v1378_v15 = vpop.xlane.xlu1 %1377 }
 0x462   :  { %v1380_v29 = vpop.xlane.xlu0 %1379  ;;  %3928 = vpow2.f32 %v1421_v55  ;;  %v1400_v17 = vsub.f32 %v4720_v12, %v1378_v15  ;;  %1443 = vadd.xlane.f32.xlu0 %v4789_v21 }
 0x463   :  { %v1401_v57 = vsub.f32 %v4717_v59, %v1380_v29  ;;  %3930 = vpow2.f32 %v1423_v27 }
 0x464   :  { %v4795_v10 = vpop.eup %3920  ;;  %v1425_v63 = vmul.f32 1.442695, %v1400_v17 }
 0x465   :  { %v1427_v19 = vmul.f32 1.442695, %v1401_v57  ;;  %v4797_v25 = vpop.eup %3922  ;;  %1445 = vadd.xlane.f32.xlu1 %v4795_v10  ;;  %v1382_v32 = vpop.xlane.xlu1 %1381 }
 0x466   :  { %v1384_v36 = vpop.xlane.xlu0 %1383  ;;  %3932 = vpow2.f32 %v1425_v63  ;;  %v1402_v18 = vsub.f32 %v4731_v30, %v1382_v32  ;;  %1447 = vadd.xlane.f32.xlu0 %v4797_v25 }
 0x467   :  { %v1403_v12 = vsub.f32 %v4734_v14, %v1384_v36  ;;  %3934 = vpow2.f32 %v1427_v19 }
 0x468   :  { %v4803_v59 = vpop.eup %3924  ;;  %v1429_v35 = vmul.f32 1.442695, %v1402_v18 }
 0x469   :  { %v1431_v23 = vmul.f32 1.442695, %v1403_v12  ;;  %v4805_v24 = vpop.eup %3926  ;;  %1449 = vadd.xlane.f32.xlu1 %v4803_v59  ;;  %v1386_v26 = vpop.xlane.xlu1 %1385 }
 0x46a   :  { %v1388_v37 = vpop.xlane.xlu0 %1387  ;;  %3936 = vpow2.f32 %v1429_v35  ;;  %v1404_v52 = vsub.f32 %v4748_v16, %v1386_v26  ;;  %1451 = vadd.xlane.f32.xlu0 %v4805_v24 }
 0x46b   :  { %v1405_v30 = vsub.f32 %v4745_v33, %v1388_v37  ;;  %3938 = vpow2.f32 %v1431_v23 }
 0x46c   :  { %v4811_v14 = vpop.eup %3928  ;;  %v1433_v42 = vmul.f32 1.442695, %v1404_v52 }
 0x46d   :  { %v1435_v38 = vmul.f32 1.442695, %v1405_v30  ;;  %v4813_v28 = vpop.eup %3930  ;;  %1453 = vadd.xlane.f32.xlu1 %v4811_v14  ;;  %v1390_v53 = vpop.xlane.xlu1 %1389 }
 0x46e   :  { %3940 = vpow2.f32 %v1433_v42  ;;  %v1406_v39 = vsub.f32 %v4756_v34, %v1390_v53  ;;  %1455 = vadd.xlane.f32.xlu0 %v4813_v28 }
 0x46f   :  { %3942 = vpow2.f32 %v1435_v38 }
 0x470   :  { %v4818_v16 = vpop.eup %3932  ;;  %v1437_v45 = vmul.f32 1.442695, %v1406_v39 }
 0x471   :  { %v4820_v33 = vpop.eup %3934  ;;  %1457 = vadd.xlane.f32.xlu1 %v4818_v16 }
 0x472   :  { %3944 = vpow2.f32 %v1437_v45  ;;  %1459 = vadd.xlane.f32.xlu0 %v4820_v33 }
 0x474   :  { %v4824_v47 = vpop.eup %3936 }
 0x475   :  { %v4826_v40 = vpop.eup %3938  ;;  %1461 = vadd.xlane.f32.xlu1 %v4824_v47 }
 0x476   :  { %1463 = vadd.xlane.f32.xlu0 %v4826_v40 }
 0x478   :  { %v4830_v34 = vpop.eup %3940 }
 0x479   :  { %v4832_v31 = vpop.eup %3942  ;;  %1465 = vadd.xlane.f32.xlu1 %v4830_v34 }
 0x47a   :  { %1467 = vadd.xlane.f32.xlu0 %v4832_v31 }
 0x47c   :  { %v4836_v22 = vpop.eup %3944 }
 0x47d   :  { %1469 = vadd.xlane.f32.xlu1 %v4836_v22 }
 0x4ea   :  { %v1440_v56 = vpop.xlane.xlu0 %1439 }
 0x4eb   :  { %3946 = vrcp.f32 %v1440_v56 }
 0x4ee   :  { %v1442_v58 = vpop.xlane.xlu1 %1441 }
 0x4ef   :  { %3948 = vrcp.f32 %v1442_v58  ;;  %v1444_v49 = vpop.xlane.xlu0 %1443 }
 0x4f0   :  { %3950 = vrcp.f32 %v1444_v49 }
 0x4f2   :  { %v1446_v2 = vpop.xlane.xlu1 %1445 }
 0x4f3   :  { %3952 = vrcp.f32 %v1446_v2  ;;  %v1448_v60 = vpop.xlane.xlu0 %1447 }
 0x4f4   :  { %3954 = vrcp.f32 %v1448_v60 }
 0x4f5   :  { %v3947_v43 = vpop.eup %3946 }
 0x4f6   :  { %v1450_v5 = vpop.xlane.xlu1 %1449  ;;  %v1487_v0 = vmul.f32 %v3947_v43, %v4782_v4 }
 0x4f7   :  { %3956 = vrcp.f32 %v1450_v5  ;;  %v1452_v44 = vpop.xlane.xlu0 %1451 }
 0x4f8   :  { %3958 = vrcp.f32 %v1452_v44 }
 0x4f9   :  { %v3949_v62 = vpop.eup %3948 }
 0x4fa   :  { %v1454_v9 = vpop.xlane.xlu1 %1453  ;;  %v1488_v61 = vmul.f32 %v3949_v62, %v4787_v6  ;;  %v3951_v50 = vpop.eup %3950 }
 0x4fb   :  { %3960 = vrcp.f32 %v1454_v9  ;;  %v1456_v3 = vpop.xlane.xlu0 %1455  ;;  %v1489_v11 = vmul.f32 %v3951_v50, %v4789_v21 }
 0x4fc   :  { %v1503_v20 = vpack.c.bf16 %v1488_v61, %v1487_v0  ;;  %3962 = vrcp.f32 %v1456_v3 }
 0x4fd   :  { %v3953_v48 = vpop.eup %3952 }
 0x4fe   :  { %v1490_v7 = vmul.f32 %v3953_v48, %v4795_v10  ;;  %v1458_v13 = vpop.xlane.xlu1 %1457  ;;  %3520 = vmatprep.mubr.bf16.mxu1 %v1503_v20  ;;  %v3955_v1 = vpop.eup %3954 }
 0x4ff   :  { %3964 = vrcp.f32 %v1458_v13  ;;  %v1460_v54 = vpop.xlane.xlu0 %1459  ;;  %v1491_v6 = vmul.f32 %v3955_v1, %v4797_v25 }
 0x500   :  { %v1504_v8 = vpack.c.bf16 %v1490_v7, %v1489_v11  ;;  %3966 = vrcp.f32 %v1460_v54  ;;  %v3978_v54 = vld [vmem:[%s5322_s0] sm:$0xff]  }
 0x501   :  { %v3957_v55 = vpop.eup %3956 }
 0x502   :  { %v1462_v4 = vpop.xlane.xlu1 %1461  ;;  %3521 = vmatmul.mubr.bf16.vlgmr.msra.gmra.mrb[48].mxu1 %v1504_v8  ;;  %v1492_v27 = vmul.f32 %v3957_v55, %v4803_v59  ;;  %v3959_v15 = vpop.eup %3958  ;;  %v3979_v8 = vld [vmem:[%s5322_s0 + $0x8] sm:$0xff]   ;;  %v3980_v55 = vld [vmem:[%s5322_s0 + $0x10] sm:$0xff]  }
 0x503   :  { %3968 = vrcp.f32 %v1462_v4  ;;  %v1464_v29 = vpop.xlane.xlu0 %1463  ;;  %v1493_v10 = vmul.f32 %v3959_v15, %v4805_v24  ;;  %v3981_v4 = vld [vmem:[%s5322_s0 + $0x18] sm:$0xff]   ;;  %v3984_v15 = vld [vmem:[%s5322_s0 + $0x30] sm:$0xff]  }
 0x504   :  { %v1505_v21 = vpack.c.bf16 %v1492_v27, %v1491_v6  ;;  %3970 = vrcp.f32 %v1464_v29  ;;  %v3982_v6 = vld [vmem:[%s5322_s0 + $0x20] sm:$0xff]   ;;  %v3983_v27 = vld [vmem:[%s5322_s0 + $0x28] sm:$0xff]   ;;  %v3985_v29 = vld [vmem:[%s5322_s0 + $0x38] sm:$0xff]  }
 0x505   :  { %v3961_v17 = vpop.eup %3960 }
 0x506   :  { %v1466_v57 = vpop.xlane.xlu1 %1465  ;;  %3524 = vmatprep.mubr.bf16.mxu1 %v1505_v21  ;;  %v1494_v63 = vmul.f32 %v3961_v17, %v4811_v14  ;;  %v3963_v19 = vpop.eup %3962  ;;  %v3828_v21 = vld [vmem:[%s5296_s13] sm:$0xff]   ;;  %v3829_v17 = vld [vmem:[%s5296_s13 + $0x8] sm:$0xff]  }
 0x507   :  { %3972 = vrcp.f32 %v1466_v57  ;;  %v1468_v32 = vpop.xlane.xlu0 %1467  ;;  %v1495_v12 = vmul.f32 %v3963_v19, %v4813_v28  ;;  %3576 = vmatprep.subr.bf16.mxu1 %v3828_v21  ;;  %v3830_v57 = vld [vmem:[%s5296_s13 + $0x10] sm:$0xff]  }
 0x508   :  { %v1506_v36 = vpack.c.bf16 %v1494_v63, %v1493_v10  ;;  %3974 = vrcp.f32 %v1468_v32  ;;  %3577 = vmatpush3.bf16.msra.mxu1 %v3828_v21  ;;  %v3831_v10 = vld [vmem:[%s5296_s13 + $0x18] sm:$0xff]  }
 0x509   :  { %v3965_v18 = vpop.eup %3964  ;;  %3578 = vmatprep.subr.bf16.mxu1 %v3829_v17 }
 0x50a   :  { %v1470_v25 = vpop.xlane.xlu1 %1469  ;;  %3525 = vmatmul.mubr.bf16.gmra.mrb[52].mxu1 %v1506_v36  ;;  %v1496_v59 = vmul.f32 %v3965_v18, %v4818_v16  ;;  %v3967_v35 = vpop.eup %3966 }
 0x50b   :  { %3976 = vrcp.f32 %v1470_v25  ;;  %v1497_v24 = vmul.f32 %v3967_v35, %v4820_v33 }
 0x50c   :  { %v1507_v23 = vpack.c.bf16 %v1496_v59, %v1495_v12  ;;  %3579 = vmatpush3.bf16.msra.mxu1 %v3829_v17 }
 0x50d   :  { %v3969_v26 = vpop.eup %3968  ;;  %3580 = vmatprep.subr.bf16.mxu1 %v3830_v57 }
 0x50e   :  { %3528 = vmatprep.mubr.bf16.mxu1 %v1507_v23  ;;  %v1498_v37 = vmul.f32 %v3969_v26, %v4824_v47  ;;  %v3971_v52 = vpop.eup %3970 }
 0x50f   :  { %v1499_v42 = vmul.f32 %v3971_v52, %v4826_v40  ;;  %v4878_v40 = vld [vmem:[%s5295_s10 + $0x8] sm:$0xff]  }
 0x510   :  { %v1508_v30 = vpack.c.bf16 %v1498_v37, %v1497_v24  ;;  %3581 = vmatpush3.bf16.msra.mxu1 %v3830_v57 }
 0x511   :  { %v3973_v14 = vpop.eup %3972  ;;  %3582 = vmatprep.subr.bf16.mxu1 %v3831_v10 }
 0x512   :  { %3529 = vmatmul.mubr.bf16.gmra.mrb[56].mxu1 %v1508_v30  ;;  %v1500_v38 = vmul.f32 %v3973_v14, %v4830_v34  ;;  %v3975_v28 = vpop.eup %3974 }
 0x513   :  { %v1501_v16 = vmul.f32 %v3975_v28, %v4832_v31 }
 0x514   :  { %v1509_v53 = vpack.c.bf16 %v1500_v38, %v1499_v42  ;;  %3583 = vmatpush3.bf16.msra.mxu1 %v3831_v10 }
 0x515   :  { %v3977_v39 = vpop.eup %3976  ;;  %3600 = vmatprep.subr.bf16.mxu1 %v4842_v51 }
 0x516   :  { %3532 = vmatprep.mubr.bf16.mxu1 %v1509_v53  ;;  %v1502_v45 = vmul.f32 %v3977_v39, %v4836_v22 }
 0x518   :  { %v3490_v56 = vpop.f32.mrb[48].mxu0  ;;  %v1510_v33 = vpack.c.bf16 %v1502_v45, %v1501_v16 }
 0x519   :  { %v1296_v58 = vpop.f32.mrb[49].mxu0 }
 0x51a   :  { %v3491_v47 = vpop.f32.mrb[50].mxu0  ;;  %3533 = vmatmul.mubr.bf16.gmra.mrb[60].mxu1 %v1510_v33  ;;  %v4987_v33 = vld [vmem:[%s5297_s12] ss:$0 sm:$0xff] }
 0x51b   :  { %v1621_v49 = vpack.c.bf16 %v3491_v47, %v3490_v56  ;;  %v1299_v2 = vpop.f32.mrb[51].mxu0 }
 0x51c   :  { %v1620_v60 = vpack.c.bf16 %v1299_v2, %v1296_v58 }
 0x51e   :  { %3540 = vmatprep.mubr.msk.bf16.mxu0 %vm167_vm0, %v1620_v60 }
 0x51f   :  { %3541 = vmatmul.mubr.msk.bf16.vlgmr.msra.gmra.mrb[64].mxu0 %vm167_vm0, %v1621_v49 }
 0x520   :  { %v3494_v34 = vpop.f32.mrb[52].mxu0  ;;  %3557 = vmatpush3.bf16.msra.mxu0 %v4856_v41 }
 0x521   :  { %v1312_v31 = vpop.f32.mrb[53].mxu0  ;;  %3558 = vmatprep.subr.bf16.mxu0 %v4878_v40 }
 0x522   :  { %v3495_v22 = vpop.f32.mrb[54].mxu0 }
 0x523   :  { %v1623_v5 = vpack.c.bf16 %v3495_v22, %v3494_v34  ;;  %v1315_v43 = vpop.f32.mrb[55].mxu0 }
 0x524   :  { %v1622_v44 = vpack.c.bf16 %v1315_v43, %v1312_v31  ;;  %3559 = vmatpush3.bf16.msra.mxu0 %v4878_v40 }
 0x525   :  { %3640 = vmatprep.subr.bf16.mxu0 %v3828_v21 }
 0x526   :  { %3544 = vmatprep.mubr.msk.bf16.mxu0 %vm167_vm0, %v1622_v44 }
 0x527   :  { %3545 = vmatmul.mubr.msk.bf16.gmra.mrb[68].mxu0 %vm167_vm0, %v1623_v5 }
 0x528   :  { %v3498_v62 = vpop.f32.mrb[56].mxu0 }
 0x529   :  { %v1328_v9 = vpop.f32.mrb[57].mxu0 }
 0x52a   :  { %v3499_v0 = vpop.f32.mrb[58].mxu0 }
 0x52b   :  { %v1625_v61 = vpack.c.bf16 %v3499_v0, %v3498_v62  ;;  %v1331_v50 = vpop.f32.mrb[59].mxu0 }
 0x52c   :  { %v1624_v3 = vpack.c.bf16 %v1331_v50, %v1328_v9 }
 0x52e   :  { %3548 = vmatprep.mubr.msk.bf16.mxu0 %vm167_vm0, %v1624_v3 }
 0x52f   :  { %3549 = vmatmul.mubr.msk.bf16.gmra.mrb[72].mxu0 %vm167_vm0, %v1625_v61 }
 0x530   :  { %v3502_v20 = vpop.f32.mrb[60].mxu0 }
 0x531   :  { %v1344_v48 = vpop.f32.mrb[61].mxu0 }
 0x532   :  { %v3503_v11 = vpop.f32.mrb[62].mxu0 }
 0x533   :  { %v1627_v7 = vpack.c.bf16 %v3503_v11, %v3502_v20  ;;  %v1347_v13 = vpop.f32.mrb[63].mxu0 }
 0x534   :  { %v1626_v1 = vpack.c.bf16 %v1347_v13, %v1344_v48 }
 0x536   :  { %3552 = vmatprep.mubr.msk.bf16.mxu0 %vm167_vm0, %v1626_v1 }
 0x537   :  { %3553 = vmatmul.mubr.msk.bf16.gmra.mrb[76].mxu0 %vm167_vm0, %v1627_v7 }
 0x538   :  { %3560 = vmatprep.mubr.msk.bf16.mxu0 %vm167_vm0, %v3978_v54 }
 0x53f   :  { %3561 = vmatmul.mubr.msk.bf16.vlgmr.msra.gmra.mrb[64].mxu0 %vm167_vm0, %v3979_v8 }
 0x540   :  { %3564 = vmatprep.mubr.msk.bf16.mxu0 %vm167_vm0, %v3980_v55  ;;  %3641 = vmatpush3.bf16.msra.mxu0 %v3828_v21 }
 0x541   :  { %3642 = vmatprep.subr.bf16.mxu0 %v3829_v17 }
 0x544   :  { %3643 = vmatpush3.bf16.msra.mxu0 %v3829_v17 }
 0x545   :  { %3644 = vmatprep.subr.bf16.mxu0 %v3830_v57 }
 0x547   :  { %3565 = vmatmul.mubr.msk.bf16.gmra.mrb[68].mxu0 %vm167_vm0, %v3981_v4 }
 0x548   :  { %3568 = vmatprep.mubr.msk.bf16.mxu0 %vm167_vm0, %v3982_v6  ;;  %3645 = vmatpush3.bf16.msra.mxu0 %v3830_v57 }
 0x549   :  { %3646 = vmatprep.subr.bf16.mxu0 %v3831_v10 }
 0x54c   :  { %3647 = vmatpush3.bf16.msra.mxu0 %v3831_v10 }
 0x54f   :  { %3569 = vmatmul.mubr.msk.bf16.gmra.mrb[72].mxu0 %vm167_vm0, %v3983_v27 }
 0x550   :  { %3572 = vmatprep.mubr.msk.bf16.mxu0 %vm167_vm0, %v3984_v15 }
 0x557   :  { %3573 = vmatmul.mubr.msk.bf16.gmra.mrb[76].mxu0 %vm167_vm0, %v3985_v29 }
 0x5d5   :  { %v4936_v63 = vpop.f32.mrb[48].mxu1 }
 0x5d6   :  { %v4938_v19 = vpop.f32.mrb[49].mxu1 }
 0x5d7   :  { %v4940_v32 = vpop.f32.mrb[50].mxu1 }
 0x5d8   :  { %v2098_v36 = vpack.c.bf16 %v4940_v32, %v4936_v63  ;;  %v4944_v18 = vpop.f32.mrb[51].mxu1  ;;  %v3988_v63 = vld [vmem:[%s5324_s8 + $0x10] sm:$0xff]   ;;  %v3990_v32 = vld [vmem:[%s5324_s8 + $0x20] sm:$0xff]  }
 0x5d9   :  { %v2097_v25 = vpack.c.bf16 %v4944_v18, %v4938_v19  ;;  %v3989_v19 = vld [vmem:[%s5324_s8 + $0x18] sm:$0xff]   ;;  %v3992_v18 = vld [vmem:[%s5324_s8 + $0x30] sm:$0xff]  }
 0x5dd   :  { %v4948_v12 = vpop.f32.mrb[52].mxu1 }
 0x5de   :  { %v4950_v59 = vpop.f32.mrb[53].mxu1 }
 0x5df   :  { %v4952_v35 = vpop.f32.mrb[54].mxu1 }
 0x5e0   :  { %v2100_v23 = vpack.c.bf16 %v4952_v35, %v4948_v12  ;;  %v4956_v26 = vpop.f32.mrb[55].mxu1  ;;  %v3994_v12 = vmov 0.0  }
 0x5e1   :  { %v2099_v24 = vpack.c.bf16 %v4956_v26, %v4950_v59  ;;  %3664 = vmatprep.subr.bf16.mxu0 %v3994_v12  ;;  %v5089_v59 = vld [vmem:[%s5298_s14] ss:$0 sm:$0xff] }
 0x5e5   :  { %v4960_v37 = vpop.f32.mrb[56].mxu1 }
 0x5e6   :  { %v4962_v52 = vpop.f32.mrb[57].mxu1 }
 0x5e7   :  { %v4964_v30 = vpop.f32.mrb[58].mxu1 }
 0x5e8   :  { %v2102_v14 = vpack.c.bf16 %v4964_v30, %v4960_v37  ;;  %v4968_v42 = vpop.f32.mrb[59].mxu1 }
 0x5e9   :  { %v2101_v38 = vpack.c.bf16 %v4968_v42, %v4962_v52 }
 0x5ed   :  { %v4972_v28 = vpop.f32.mrb[60].mxu1 }
 0x5ee   :  { %v4974_v53 = vpop.f32.mrb[61].mxu1 }
 0x5ef   :  { %v4976_v39 = vpop.f32.mrb[62].mxu1 }
 0x5f0   :  { %v2104_v16 = vpack.c.bf16 %v4976_v39, %v4972_v28  ;;  %v4980_v45 = vpop.f32.mrb[63].mxu1 }
 0x5f1   :  { %v2103_v56 = vpack.c.bf16 %v4980_v45, %v4974_v53 }
 0x612   :  { %v3562_v58 = vpop.f32.mrb[64].mxu0 }
 0x613   :  { %v1883_v47 = vadd.f32 %v3562_v58, %v4987_v33  ;;  %v1811_v49 = vpop.f32.mrb[65].mxu0 }
 0x614   :  { %v1881_v2 = vadd.f32 %v4987_v33, %v1811_v49  ;;  %v3563_v60 = vpop.f32.mrb[66].mxu0 }
 0x615   :  { %v1884_v34 = vadd.f32 %v3563_v60, %v4987_v33  ;;  %v1814_v31 = vpop.f32.mrb[67].mxu0  ;;  %v1899_v5 = vmax.f32 %v1883_v47, 0.0 }
 0x616   :  { %v1882_v22 = vadd.f32 %v4987_v33, %v1814_v31  ;;  %v1897_v44 = vmax.f32 %v1881_v2, 0.0 }
 0x617   :  { %v1900_v43 = vmax.f32 %v1884_v34, 0.0 }
 0x618   :  { %v1898_v62 = vmax.f32 %v1882_v22, 0.0 }
 0x619   :  { %v1914_v9 = vpack.c.bf16 %v1900_v43, %v1899_v5 }
 0x61a   :  { %v1913_v0 = vpack.c.bf16 %v1898_v62, %v1897_v44  ;;  %v3566_v61 = vpop.f32.mrb[68].mxu0 }
 0x61b   :  { %v1887_v50 = vadd.f32 %v3566_v61, %v4987_v33  ;;  %v1827_v3 = vpop.f32.mrb[69].mxu0 }
 0x61c   :  { %v1885_v20 = vadd.f32 %v4987_v33, %v1827_v3  ;;  %v3567_v48 = vpop.f32.mrb[70].mxu0  ;;  %3584 = vmatprep.mubr.msk.bf16.mxu1 %vm352_vm1, %v1913_v0 }
 0x61d   :  { %v1888_v11 = vadd.f32 %v3567_v48, %v4987_v33  ;;  %v1830_v7 = vpop.f32.mrb[71].mxu0  ;;  %3585 = vmatmul.mubr.msk.bf16.vlgmr.msra.gmra.mrb[64].mxu1 %vm352_vm1, %v1914_v9  ;;  %v1903_v1 = vmax.f32 %v1887_v50, 0.0 }
 0x61e   :  { %v1886_v13 = vadd.f32 %v4987_v33, %v1830_v7  ;;  %3601 = vmatpush3.bf16.msra.mxu1 %v4842_v51  ;;  %v1901_v8 = vmax.f32 %v1885_v20, 0.0 }
 0x61f   :  { %v1904_v54 = vmax.f32 %v1888_v11, 0.0  ;;  %3602 = vmatprep.subr.bf16.mxu1 %v4849_v46 }
 0x620   :  { %v1902_v55 = vmax.f32 %v1886_v13, 0.0 }
 0x621   :  { %v1916_v4 = vpack.c.bf16 %v1904_v54, %v1903_v1 }
 0x622   :  { %v1915_v6 = vpack.c.bf16 %v1902_v55, %v1901_v8  ;;  %v3570_v27 = vpop.f32.mrb[72].mxu0  ;;  %3603 = vmatpush3.bf16.msra.mxu1 %v4849_v46 }
 0x623   :  { %v1891_v15 = vadd.f32 %v3570_v27, %v4987_v33  ;;  %v1843_v29 = vpop.f32.mrb[73].mxu0  ;;  %3620 = vmatprep.subr.bf16.mxu1 %v4856_v41 }
 0x624   :  { %v1889_v21 = vadd.f32 %v4987_v33, %v1843_v29  ;;  %v3571_v17 = vpop.f32.mrb[74].mxu0  ;;  %3588 = vmatprep.mubr.msk.bf16.mxu1 %vm352_vm1, %v1915_v6 }
 0x625   :  { %v1892_v51 = vadd.f32 %v3571_v17, %v4987_v33  ;;  %v1846_v57 = vpop.f32.mrb[75].mxu0  ;;  %3589 = vmatmul.mubr.msk.bf16.gmra.mrb[68].mxu1 %vm352_vm1, %v1916_v4  ;;  %v1907_v58 = vmax.f32 %v1891_v15, 0.0 }
 0x626   :  { %v1890_v10 = vadd.f32 %v4987_v33, %v1846_v57  ;;  %v1905_v46 = vmax.f32 %v1889_v21, 0.0 }
 0x627   :  { %v1908_v47 = vmax.f32 %v1892_v51, 0.0 }
 0x628   :  { %v1906_v49 = vmax.f32 %v1890_v10, 0.0 }
 0x629   :  { %v1918_v2 = vpack.c.bf16 %v1908_v47, %v1907_v58 }
 0x62a   :  { %v1917_v60 = vpack.c.bf16 %v1906_v49, %v1905_v46  ;;  %v3574_v34 = vpop.f32.mrb[76].mxu0 }
 0x62b   :  { %v1895_v31 = vadd.f32 %v3574_v34, %v4987_v33  ;;  %v1859_v22 = vpop.f32.mrb[77].mxu0 }
 0x62c   :  { %v1893_v5 = vadd.f32 %v4987_v33, %v1859_v22  ;;  %v3575_v43 = vpop.f32.mrb[78].mxu0  ;;  %3592 = vmatprep.mubr.msk.bf16.mxu1 %vm352_vm1, %v1917_v60 }
 0x62d   :  { %v1896_v44 = vadd.f32 %v3575_v43, %v4987_v33  ;;  %v1862_v62 = vpop.f32.mrb[79].mxu0  ;;  %3593 = vmatmul.mubr.msk.bf16.gmra.mrb[72].mxu1 %vm352_vm1, %v1918_v2  ;;  %v1911_v0 = vmax.f32 %v1895_v31, 0.0 }
 0x62e   :  { %v1894_v9 = vadd.f32 %v4987_v33, %v1862_v62  ;;  %v1909_v50 = vmax.f32 %v1893_v5, 0.0 }
 0x62f   :  { %v1912_v61 = vmax.f32 %v1896_v44, 0.0 }
 0x630   :  { %v1910_v3 = vmax.f32 %v1894_v9, 0.0 }
 0x631   :  { %v1920_v20 = vpack.c.bf16 %v1912_v61, %v1911_v0 }
 0x632   :  { %v1919_v48 = vpack.c.bf16 %v1910_v3, %v1909_v50 }
 0x634   :  { %3596 = vmatprep.mubr.msk.bf16.mxu1 %vm352_vm1, %v1919_v48 }
 0x635   :  { %3597 = vmatmul.mubr.msk.bf16.gmra.mrb[76].mxu1 %vm352_vm1, %v1920_v20 }
 0x636   :  { %3604 = vmatprep.mubr.msk.bf16.mxu1 %vm167_vm0, %v2097_v25  ;;  %v3993_v25 = vld [vmem:[%s5324_s8 + $0x38] sm:$0xff]  }
 0x63d   :  { %3605 = vmatmul.mubr.msk.bf16.vlgmr.msra.gmra.mrb[80].mxu1 %vm167_vm0, %v2098_v36  ;;  %v3991_v36 = vld [vmem:[%s5324_s8 + $0x28] sm:$0xff]  }
 0x63e   :  { %3608 = vmatprep.mubr.msk.bf16.mxu1 %vm167_vm0, %v2099_v24  ;;  %3621 = vmatpush3.bf16.msra.mxu1 %v4856_v41  ;;  %v3986_v41 = vld [vmem:[%s5324_s8] sm:$0xff]  }
 0x63f   :  { %3622 = vmatprep.subr.bf16.mxu1 %v4878_v40 }
 0x642   :  { %3623 = vmatpush3.bf16.msra.mxu1 %v4878_v40  ;;  %v3987_v40 = vld [vmem:[%s5324_s8 + $0x8] sm:$0xff]  }
 0x643   :  { %3684 = vmatprep.subr.bf16.mxu1 %v3994_v12 }
 0x645   :  { %3609 = vmatmul.mubr.msk.bf16.gmra.mrb[84].mxu1 %vm167_vm0, %v2100_v23 }
 0x646   :  { %3612 = vmatprep.mubr.msk.bf16.mxu1 %vm167_vm0, %v2101_v38 }
 0x64d   :  { %3613 = vmatmul.mubr.msk.bf16.gmra.mrb[88].mxu1 %vm167_vm0, %v2102_v14 }
 0x64e   :  { %3616 = vmatprep.mubr.msk.bf16.mxu1 %vm167_vm0, %v2103_v56 }
 0x655   :  { %3617 = vmatmul.mubr.msk.bf16.gmra.mrb[92].mxu1 %vm167_vm0, %v2104_v16 }
 0x656   :  { %3624 = vmatprep.mubr.msk.bf16.mxu1 %vm167_vm0, %v3986_v41 }
 0x65d   :  { %3625 = vmatmul.mubr.msk.bf16.vlgmr.msra.gmra.mrb[80].mxu1 %vm167_vm0, %v3987_v40 }
 0x65e   :  { %3628 = vmatprep.mubr.msk.bf16.mxu1 %vm167_vm0, %v3988_v63 }
 0x665   :  { %3629 = vmatmul.mubr.msk.bf16.gmra.mrb[84].mxu1 %vm167_vm0, %v3989_v19 }
 0x666   :  { %3632 = vmatprep.mubr.msk.bf16.mxu1 %vm167_vm0, %v3990_v32 }
 0x66d   :  { %3633 = vmatmul.mubr.msk.bf16.gmra.mrb[88].mxu1 %vm167_vm0, %v3991_v36 }
 0x66e   :  { %3636 = vmatprep.mubr.msk.bf16.mxu1 %vm167_vm0, %v3992_v18 }
 0x675   :  { %3637 = vmatmul.mubr.msk.bf16.gmra.mrb[92].mxu1 %vm167_vm0, %v3993_v25 }
 0x676   :  { %3700 = vmatprep.mubr.msk.bf16.mxu1 %vm3995_vm2, %v3994_v12 }
 0x6f0   :  { %v3586_v35 = vpop.f32.mrb[64].mxu1 }
 0x6f1   :  { %v2027_v23 = vadd.f32 %v3586_v35, %v5089_v59  ;;  %v2018_v26 = vpop.f32.mrb[65].mxu1 }
 0x6f2   :  { %v2019_v24 = vadd.f32 %v5089_v59, %v2018_v26  ;;  %v3587_v37 = vpop.f32.mrb[66].mxu1 }
 0x6f3   :  { %v2030_v52 = vadd.f32 %v3587_v37, %v5089_v59  ;;  %v2021_v30 = vpop.f32.mrb[67].mxu1  ;;  %v2083_v42 = vmax.f32 %v2027_v23, 0.0 }
 0x6f4   :  { %v2022_v14 = vadd.f32 %v5089_v59, %v2021_v30  ;;  %v2081_v28 = vmax.f32 %v2019_v24, 0.0 }
 0x6f5   :  { %v2084_v38 = vmax.f32 %v2030_v52, 0.0 }
 0x6f6   :  { %v2082_v53 = vmax.f32 %v2022_v14, 0.0 }
 0x6f7   :  { %v5095_v39 = vpack.c.bf16 %v2084_v38, %v2083_v42 }
 0x6f8   :  { %v5097_v16 = vpack.c.bf16 %v2082_v53, %v2081_v28  ;;  %v3590_v45 = vpop.f32.mrb[68].mxu1 }
 0x6f9   :  { %v2043_v56 = vadd.f32 %v3590_v45, %v5089_v59  ;;  %v2034_v11 = vpop.f32.mrb[69].mxu1 }
 0x6fa   :  { %v2035_v7 = vadd.f32 %v5089_v59, %v2034_v11  ;;  %v3591_v13 = vpop.f32.mrb[70].mxu1 }
 0x6fb   :  { %v2046_v1 = vadd.f32 %v3591_v13, %v5089_v59  ;;  %v2037_v54 = vpop.f32.mrb[71].mxu1  ;;  %v2087_v55 = vmax.f32 %v2043_v56, 0.0 }
 0x6fc   :  { %v2038_v8 = vadd.f32 %v5089_v59, %v2037_v54  ;;  %v2085_v6 = vmax.f32 %v2035_v7, 0.0 }
 0x6fd   :  { %v2088_v4 = vmax.f32 %v2046_v1, 0.0 }
 0x6fe   :  { %v2086_v27 = vmax.f32 %v2038_v8, 0.0 }
 0x6ff   :  { %v5103_v15 = vpack.c.bf16 %v2088_v4, %v2087_v55 }
 0x700   :  { %v5105_v29 = vpack.c.bf16 %v2086_v27, %v2085_v6  ;;  %v3594_v21 = vpop.f32.mrb[72].mxu1 }
 0x701   :  { %v2059_v17 = vadd.f32 %v3594_v21, %v5089_v59  ;;  %v2050_v51 = vpop.f32.mrb[73].mxu1 }
 0x702   :  { %v2051_v57 = vadd.f32 %v5089_v59, %v2050_v51  ;;  %v3595_v10 = vpop.f32.mrb[74].mxu1 }
 0x703   :  { %v2062_v58 = vadd.f32 %v3595_v10, %v5089_v59  ;;  %v2053_v47 = vpop.f32.mrb[75].mxu1  ;;  %v2091_v49 = vmax.f32 %v2059_v17, 0.0 }
 0x704   :  { %v2054_v46 = vadd.f32 %v5089_v59, %v2053_v47  ;;  %v2089_v60 = vmax.f32 %v2051_v57, 0.0 }
 0x705   :  { %v2092_v2 = vmax.f32 %v2062_v58, 0.0 }
 0x706   :  { %v2090_v34 = vmax.f32 %v2054_v46, 0.0 }
 0x707   :  { %v5111_v31 = vpack.c.bf16 %v2092_v2, %v2091_v49 }
 0x708   :  { %v5113_v22 = vpack.c.bf16 %v2090_v34, %v2089_v60  ;;  %v3598_v5 = vpop.f32.mrb[76].mxu1 }
 0x709   :  { %v2075_v43 = vadd.f32 %v3598_v5, %v5089_v59  ;;  %v2066_v44 = vpop.f32.mrb[77].mxu1 }
 0x70a   :  { %v2067_v62 = vadd.f32 %v5089_v59, %v2066_v44  ;;  %v3599_v9 = vpop.f32.mrb[78].mxu1 }
 0x70b   :  { %v2078_v0 = vadd.f32 %v3599_v9, %v5089_v59  ;;  %v2069_v61 = vpop.f32.mrb[79].mxu1  ;;  %v2095_v3 = vmax.f32 %v2075_v43, 0.0 }
 0x70c   :  { %v2070_v50 = vadd.f32 %v5089_v59, %v2069_v61  ;;  %v2093_v48 = vmax.f32 %v2067_v62, 0.0 }
 0x70d   :  { %v2096_v20 = vmax.f32 %v2078_v0, 0.0 }
 0x70e   :  { %v2094_v41 = vmax.f32 %v2070_v50, 0.0 }
 0x70f   :  { %v5119_v40 = vpack.c.bf16 %v2096_v20, %v2095_v3 }
 0x710   :  { %v5121_v63 = vpack.c.bf16 %v2094_v41, %v2093_v48  ;;  %v3839_v41 = vld [vmem:[%s5302_s16 + $0x10] sm:$0xff]  }
 0x730   :  { %v3626_v19 = vpop.f32.mrb[80].mxu1 }
 0x731   :  { %v2325_v32 = vadd.f32 %v3626_v19, %v4987_v33  ;;  %v2260_v36 = vpop.f32.mrb[81].mxu1 }
 0x732   :  { %v2323_v18 = vadd.f32 %v4987_v33, %v2260_v36  ;;  %v3627_v25 = vpop.f32.mrb[82].mxu1 }
 0x733   :  { %v2326_v35 = vadd.f32 %v3627_v25, %v4987_v33  ;;  %v2263_v23 = vpop.f32.mrb[83].mxu1  ;;  %v2341_v24 = vmax.f32 %v2325_v32, 0.0 }
 0x734   :  { %v2324_v26 = vadd.f32 %v4987_v33, %v2263_v23  ;;  %v2339_v52 = vmax.f32 %v2323_v18, 0.0 }
 0x735   :  { %v2342_v37 = vmax.f32 %v2326_v35, 0.0 }
 0x736   :  { %v2340_v30 = vmax.f32 %v2324_v26, 0.0 }
 0x737   :  { %v2356_v14 = vpack.c.bf16 %v2342_v37, %v2341_v24 }
 0x738   :  { %v2355_v42 = vpack.c.bf16 %v2340_v30, %v2339_v52  ;;  %v3630_v38 = vpop.f32.mrb[84].mxu1 }
 0x739   :  { %v2329_v28 = vadd.f32 %v3630_v38, %v4987_v33  ;;  %v2276_v53 = vpop.f32.mrb[85].mxu1 }
 0x73a   :  { %v2327_v45 = vadd.f32 %v4987_v33, %v2276_v53  ;;  %v3631_v56 = vpop.f32.mrb[86].mxu1  ;;  %3648 = vmatprep.mubr.msk.bf16.mxu0 %vm352_vm1, %v2355_v42 }
 0x73b   :  { %v2330_v11 = vadd.f32 %v3631_v56, %v4987_v33  ;;  %v2279_v7 = vpop.f32.mrb[87].mxu1  ;;  %3649 = vmatmul.mubr.msk.bf16.vlgmr.msra.gmra.mrb[80].mxu0 %vm352_vm1, %v2356_v14  ;;  %v2345_v1 = vmax.f32 %v2329_v28, 0.0 }
 0x73c   :  { %v2328_v13 = vadd.f32 %v4987_v33, %v2279_v7  ;;  %3665 = vmatpush3.bf16.msra.mxu0 %v5097_v16  ;;  %v2343_v8 = vmax.f32 %v2327_v45, 0.0 }
 0x73d   :  { %v2346_v54 = vmax.f32 %v2330_v11, 0.0  ;;  %3666 = vmatprep.subr.bf16.mxu0 %v3994_v12 }
 0x73e   :  { %v2344_v55 = vmax.f32 %v2328_v13, 0.0 }
 0x73f   :  { %v2358_v4 = vpack.c.bf16 %v2346_v54, %v2345_v1 }
 0x740   :  { %v2357_v6 = vpack.c.bf16 %v2344_v55, %v2343_v8  ;;  %3667 = vmatpush3.bf16.msra.mxu0 %v5095_v39  ;;  %v3634_v27 = vpop.f32.mrb[88].mxu1 }
 0x741   :  { %v2333_v21 = vadd.f32 %v3634_v27, %v4987_v33  ;;  %v2292_v17 = vpop.f32.mrb[89].mxu1  ;;  %3668 = vmatprep.subr.bf16.mxu0 %v3994_v12 }
 0x742   :  { %v2331_v51 = vadd.f32 %v4987_v33, %v2292_v17  ;;  %v3635_v57 = vpop.f32.mrb[90].mxu1  ;;  %3652 = vmatprep.mubr.msk.bf16.mxu0 %vm352_vm1, %v2357_v6 }
 0x743   :  { %v2334_v16 = vadd.f32 %v3635_v57, %v4987_v33  ;;  %v2295_v10 = vpop.f32.mrb[91].mxu1  ;;  %3653 = vmatmul.mubr.msk.bf16.gmra.mrb[84].mxu0 %vm352_vm1, %v2358_v4  ;;  %v2349_v39 = vmax.f32 %v2333_v21, 0.0 }
 0x744   :  { %v2332_v58 = vadd.f32 %v4987_v33, %v2295_v10  ;;  %3669 = vmatpush3.bf16.msra.mxu0 %v5105_v29  ;;  %v2347_v46 = vmax.f32 %v2331_v51, 0.0 }
 0x745   :  { %v2350_v47 = vmax.f32 %v2334_v16, 0.0  ;;  %3670 = vmatprep.subr.bf16.mxu0 %v3994_v12 }
 0x746   :  { %v2348_v49 = vmax.f32 %v2332_v58, 0.0 }
 0x747   :  { %v2360_v2 = vpack.c.bf16 %v2350_v47, %v2349_v39 }
 0x748   :  { %v2359_v60 = vpack.c.bf16 %v2348_v49, %v2347_v46  ;;  %3671 = vmatpush3.bf16.msra.mxu0 %v5103_v15  ;;  %v3638_v34 = vpop.f32.mrb[92].mxu1 }
 0x749   :  { %v2337_v5 = vadd.f32 %v3638_v34, %v4987_v33  ;;  %v2308_v43 = vpop.f32.mrb[93].mxu1  ;;  %3672 = vmatprep.subr.bf16.mxu0 %v3994_v12 }
 0x74a   :  { %v2335_v44 = vadd.f32 %v4987_v33, %v2308_v43  ;;  %v3639_v62 = vpop.f32.mrb[94].mxu1  ;;  %3656 = vmatprep.mubr.msk.bf16.mxu0 %vm352_vm1, %v2359_v60 }
 0x74b   :  { %v2338_v29 = vadd.f32 %v3639_v62, %v4987_v33  ;;  %v2311_v9 = vpop.f32.mrb[95].mxu1  ;;  %3657 = vmatmul.mubr.msk.bf16.gmra.mrb[88].mxu0 %vm352_vm1, %v2360_v2  ;;  %v2353_v15 = vmax.f32 %v2337_v5, 0.0 }
 0x74c   :  { %v2336_v0 = vadd.f32 %v4987_v33, %v2311_v9  ;;  %3673 = vmatpush3.bf16.msra.mxu0 %v5113_v22  ;;  %v2351_v50 = vmax.f32 %v2335_v44, 0.0  ;;  %v3832_v33 = vld [vmem:[%s5299_s4] sm:$0xff]   ;;  %v3837_v22 = vld [vmem:[%s5302_s16 + $0x8] sm:$0xff]  }
 0x74d   :  { %v2354_v61 = vmax.f32 %v2338_v29, 0.0  ;;  %3674 = vmatprep.subr.bf16.mxu0 %v3994_v12 }
 0x74e   :  { %v2352_v3 = vmax.f32 %v2336_v0, 0.0 }
 0x74f   :  { %v2362_v20 = vpack.c.bf16 %v2354_v61, %v2353_v15 }
 0x750   :  { %v2361_v48 = vpack.c.bf16 %v2352_v3, %v2351_v50  ;;  %3675 = vmatpush3.bf16.msra.mxu0 %v5111_v31  ;;  %v3835_v31 = vld [vmem:[%s5302_s16] sm:$0xff]  }
 0x751   :  { %3676 = vmatprep.subr.bf16.mxu0 %v3994_v12 }
 0x752   :  { %3660 = vmatprep.mubr.msk.bf16.mxu0 %vm352_vm1, %v2361_v48  ;;  %v3836_v48 = vld [vmem:[%s5301_s15 + $0x8] sm:$0xff]  }
 0x753   :  { %3661 = vmatmul.mubr.msk.bf16.gmra.mrb[92].mxu0 %vm352_vm1, %v2362_v20  ;;  %v3833_v20 = vld [vmem:[%s5300_s5] sm:$0xff]  }
 0x754   :  { %3677 = vmatpush3.bf16.msra.mxu0 %v5121_v63  ;;  %3680 = vmatprep.mubr.msk.bf16.mxu0 %vm3995_vm2, %v3994_v12 }
 0x755   :  { %3678 = vmatprep.subr.bf16.mxu0 %v3994_v12 }
 0x758   :  { %3679 = vmatpush3.bf16.msra.mxu0 %v5119_v40 }
 0x759   :  { %3704 = vmatprep.subr.bf16.mxu0 %v3994_v12 }
 0x75b   :  { %3681 = vmatmul.mubr.bf16.vlgmr.msra.gmra.mrb[96].mxu0 %v3832_v33  ;;  %v3838_v33 = vld [vmem:[%s5301_s15 + $0x10] sm:$0xff]  }
 0x75c   :  { %3712 = vmatprep.mubr.msk.bf16.mxu0 %vm3995_vm2, %v3994_v12  ;;  %3705 = vmatpush3.bf16.msra.mxu0 %v3835_v31  ;;  %v3840_v31 = vld [vmem:[%s5301_s15 + $0x18] sm:$0xff]  }
 0x75d   :  { %3706 = vmatprep.subr.bf16.mxu0 %v3994_v12 }
 0x760   :  { %3707 = vmatpush3.bf16.msra.mxu0 %v3837_v22 }
 0x761   :  { %3708 = vmatprep.subr.bf16.mxu0 %v3994_v12 }
 0x764   :  { %3709 = vmatpush3.bf16.msra.mxu0 %v3839_v41 }
 0x765   :  { %3710 = vmatprep.subr.bf16.mxu0 %v3994_v12 }
 0x80e   :  { %v3650_v40 = vpop.f32.mrb[80].mxu0 }
 0x80f   :  { %v2430_v63 = vadd.f32 %v3650_v40, %v5089_v59  ;;  %v2421_v19 = vpop.f32.mrb[81].mxu0 }
 0x810   :  { %v2422_v32 = vadd.f32 %v5089_v59, %v2421_v19  ;;  %v3651_v36 = vpop.f32.mrb[82].mxu0 }
 0x811   :  { %v2433_v18 = vadd.f32 %v3651_v36, %v5089_v59  ;;  %v2424_v25 = vpop.f32.mrb[83].mxu0  ;;  %v2486_v23 = vmax.f32 %v2430_v63, 0.0 }
 0x812   :  { %v2425_v35 = vadd.f32 %v5089_v59, %v2424_v25  ;;  %v2484_v24 = vmax.f32 %v2422_v32, 0.0  ;;  %v3841_v32 = vld [vmem:[%s5302_s16 + $0x18] sm:$0xff]  }
 0x813   :  { %v2487_v26 = vmax.f32 %v2433_v18, 0.0  ;;  %3711 = vmatpush3.bf16.msra.mxu0 %v3841_v32 }
 0x814   :  { %v2485_v37 = vmax.f32 %v2425_v35, 0.0  ;;  %3728 = vmatprep.subr.bf16.mxu0 %v3994_v12  ;;  %v3842_v35 = vld [vmem:[%s5303_s18] sm:$0xff]  }
 0x815   :  { %v2560_v52 = vpack.c.bf16 %v2487_v26, %v2486_v23 }
 0x816   :  { %v2559_v30 = vpack.c.bf16 %v2485_v37, %v2484_v24  ;;  %v3654_v14 = vpop.f32.mrb[84].mxu0 }
 0x817   :  { %v2446_v42 = vadd.f32 %v3654_v14, %v5089_v59  ;;  %v2437_v38 = vpop.f32.mrb[85].mxu0  ;;  %v3843_v14 = vld [vmem:[%s5303_s18 + $0x8] sm:$0xff]  }
 0x818   :  { %v2438_v28 = vadd.f32 %v5089_v59, %v2437_v38  ;;  %v3655_v53 = vpop.f32.mrb[86].mxu0  ;;  %3685 = vmatpush3.bf16.msra.mxu1 %v2559_v30  ;;  %v3845_v38 = vld [vmem:[%s5303_s18 + $0x18] sm:$0xff]  }
 0x819   :  { %v2449_v45 = vadd.f32 %v3655_v53, %v5089_v59  ;;  %v2440_v56 = vpop.f32.mrb[87].mxu0  ;;  %3686 = vmatprep.subr.bf16.mxu1 %v3994_v12  ;;  %v2490_v7 = vmax.f32 %v2446_v42, 0.0  ;;  %v3844_v42 = vld [vmem:[%s5303_s18 + $0x10] sm:$0xff]   ;;  %v3847_v53 = vld [vmem:[%s5304_s20 + $0x8] sm:$0xff]  }
 0x81a   :  { %v2441_v11 = vadd.f32 %v5089_v59, %v2440_v56  ;;  %v2488_v1 = vmax.f32 %v2438_v28, 0.0  ;;  %v3846_v28 = vld [vmem:[%s5304_s20] sm:$0xff]  }
 0x81b   :  { %v2491_v13 = vmax.f32 %v2449_v45, 0.0  ;;  %v3097_v56 = vld [vmem:[%s5305_s17] ss:$0 sm:$0xff] }
 0x81c   :  { %v2489_v54 = vmax.f32 %v2441_v11, 0.0  ;;  %3687 = vmatpush3.bf16.msra.mxu1 %v2560_v52 }
 0x81d   :  { %v2562_v8 = vpack.c.bf16 %v2491_v13, %v2490_v7  ;;  %3688 = vmatprep.subr.bf16.mxu1 %v3994_v12 }
 0x81e   :  { %v2561_v55 = vpack.c.bf16 %v2489_v54, %v2488_v1  ;;  %v3658_v4 = vpop.f32.mrb[88].mxu0 }
 0x81f   :  { %v2462_v6 = vadd.f32 %v3658_v4, %v5089_v59  ;;  %v2453_v27 = vpop.f32.mrb[89].mxu0 }
 0x820   :  { %v2454_v21 = vadd.f32 %v5089_v59, %v2453_v27  ;;  %v3659_v17 = vpop.f32.mrb[90].mxu0  ;;  %3689 = vmatpush3.bf16.msra.mxu1 %v2561_v55 }
 0x821   :  { %v2465_v51 = vadd.f32 %v3659_v17, %v5089_v59  ;;  %v2456_v57 = vpop.f32.mrb[91].mxu0  ;;  %3690 = vmatprep.subr.bf16.mxu1 %v3994_v12  ;;  %v2494_v10 = vmax.f32 %v2462_v6, 0.0  ;;  %v3849_v17 = vld [vmem:[%s5304_s20 + $0x18] sm:$0xff]  }
 0x822   :  { %v2457_v16 = vadd.f32 %v5089_v59, %v2456_v57  ;;  %v2492_v39 = vmax.f32 %v2454_v21, 0.0  ;;  %v3848_v21 = vld [vmem:[%s5304_s20 + $0x10] sm:$0xff]  }
 0x823   :  { %v2495_v58 = vmax.f32 %v2465_v51, 0.0  ;;  %v3098_v51 = vld [vmem:[%s5306_s19] ss:$0 sm:$0xff] }
 0x824   :  { %v2493_v47 = vmax.f32 %v2457_v16, 0.0  ;;  %3691 = vmatpush3.bf16.msra.mxu1 %v2562_v8 }
 0x825   :  { %v2564_v46 = vpack.c.bf16 %v2495_v58, %v2494_v10  ;;  %3692 = vmatprep.subr.bf16.mxu1 %v3994_v12 }
 0x826   :  { %v2563_v49 = vpack.c.bf16 %v2493_v47, %v2492_v39  ;;  %v3662_v2 = vpop.f32.mrb[92].mxu0 }
 0x827   :  { %v2478_v60 = vadd.f32 %v3662_v2, %v5089_v59  ;;  %v2469_v34 = vpop.f32.mrb[93].mxu0 }
 0x828   :  { %v2470_v5 = vadd.f32 %v5089_v59, %v2469_v34  ;;  %v3663_v43 = vpop.f32.mrb[94].mxu0  ;;  %3693 = vmatpush3.bf16.msra.mxu1 %v2563_v49 }
 0x829   :  { %v2481_v44 = vadd.f32 %v3663_v43, %v5089_v59  ;;  %v2472_v62 = vpop.f32.mrb[95].mxu0  ;;  %3694 = vmatprep.subr.bf16.mxu1 %v3994_v12  ;;  %v2498_v9 = vmax.f32 %v2478_v60, 0.0 }
 0x82a   :  { %v2473_v29 = vadd.f32 %v5089_v59, %v2472_v62  ;;  %v2496_v15 = vmax.f32 %v2470_v5, 0.0  ;;  %v3834_v59 = vld [vmem:[%s5301_s15] sm:$0xff]  }
 0x82b   :  { %v2499_v0 = vmax.f32 %v2481_v44, 0.0 }
 0x82c   :  { %v2497_v61 = vmax.f32 %v2473_v29, 0.0  ;;  %3695 = vmatpush3.bf16.msra.mxu1 %v2564_v46 }
 0x82d   :  { %v2566_v50 = vpack.c.bf16 %v2499_v0, %v2498_v9  ;;  %3696 = vmatprep.subr.bf16.mxu1 %v3994_v12 }
 0x82e   :  { %v2565_v3 = vpack.c.bf16 %v2497_v61, %v2496_v15  ;;  %v2550_v22 = vpop.f32.mrb[96].mxu0 }
 0x82f   :  { %v3682_v41 = vpop.f32.mrb[97].mxu0 }
 0x830   :  { %3697 = vmatpush3.bf16.msra.mxu1 %v2565_v3  ;;  %v2553_v40 = vpop.f32.mrb[98].mxu0 }
 0x831   :  { %3698 = vmatprep.subr.bf16.mxu1 %v3994_v12  ;;  %v2614_v63 = vpack.c.bf16 %v2553_v40, %v2550_v22  ;;  %v3683_v19 = vpop.f32.mrb[99].mxu0 }
 0x834   :  { %3699 = vmatpush3.bf16.msra.mxu1 %v2566_v50 }
 0x835   :  { %3716 = vmatprep.subr.bf16.mxu1 %v3994_v12 }
 0x837   :  { %3701 = vmatmul.mubr.bf16.vlgmr.msra.gmra.mrb[96].mxu1 %v3833_v20 }
 0x838   :  { %3717 = vmatpush3.bf16.msra.mxu1 %v3834_v59  ;;  %3724 = vmatprep.mubr.msk.bf16.mxu1 %vm3995_vm2, %v3994_v12 }
 0x839   :  { %3718 = vmatprep.subr.bf16.mxu1 %v3994_v12 }
 0x83c   :  { %3719 = vmatpush3.bf16.msra.mxu1 %v3836_v48 }
 0x83d   :  { %3720 = vmatprep.subr.bf16.mxu1 %v3994_v12 }
 0x840   :  { %3721 = vmatpush3.bf16.msra.mxu1 %v3838_v33 }
 0x841   :  { %3722 = vmatprep.subr.bf16.mxu1 %v3994_v12 }
 0x844   :  { %3723 = vmatpush3.bf16.msra.mxu1 %v3840_v31 }
 0x845   :  { %3740 = vmatprep.subr.bf16.mxu1 %v3994_v12 }
 0x847   :  { %3725 = vmatmul.mubr.msk.bf16.vlgmr.msra.gmra.mrb[100].mxu1 %vm352_vm1, %v2614_v63 }
 0x848   :  { %3748 = vmatprep.mubr.msk.bf16.mxu1 %vm3995_vm2, %v3994_v12  ;;  %3741 = vmatpush3.bf16.msra.mxu1 %v3846_v28 }
 0x849   :  { %3742 = vmatprep.subr.bf16.mxu1 %v3994_v12 }
 0x84c   :  { %3743 = vmatpush3.bf16.msra.mxu1 %v3847_v53 }
 0x84d   :  { %3744 = vmatprep.subr.bf16.mxu1 %v3994_v12 }
 0x850   :  { %3745 = vmatpush3.bf16.msra.mxu1 %v3848_v21 }
 0x851   :  { %3746 = vmatprep.subr.bf16.mxu1 %v3994_v12 }
 0x854   :  { %3747 = vmatpush3.bf16.msra.mxu1 %v3849_v17 }
 0x90a   :  { %v2607_v36 = vpop.f32.mrb[96].mxu1 }
 0x90b   :  { %v3702_v18 = vpop.f32.mrb[97].mxu1 }
 0x90c   :  { %v2610_v25 = vpop.f32.mrb[98].mxu1 }
 0x90d   :  { %v2623_v23 = vpack.c.bf16 %v2610_v25, %v2607_v36  ;;  %v3703_v26 = vpop.f32.mrb[99].mxu1 }
 0x90f   :  { %3713 = vmatmul.mubr.msk.bf16.vlgmr.msra.gmra.mrb[100].mxu0 %vm352_vm1, %v2623_v23 }
 0x910   :  { %3729 = vmatpush3.bf16.msra.mxu0 %v3842_v35  ;;  %3736 = vmatprep.mubr.msk.bf16.mxu0 %vm3995_vm2, %v3994_v12 }
 0x911   :  { %3730 = vmatprep.subr.bf16.mxu0 %v3994_v12 }
 0x914   :  { %3731 = vmatpush3.bf16.msra.mxu0 %v3843_v14 }
 0x915   :  { %3732 = vmatprep.subr.bf16.mxu0 %v3994_v12 }
 0x918   :  { %3733 = vmatpush3.bf16.msra.mxu0 %v3844_v42 }
 0x919   :  { %3734 = vmatprep.subr.bf16.mxu0 %v3994_v12  ;;  %v3104_v12 = vld [vmem:[%s5307_s21] ss:$0 sm:$0xff] }
 0x91a   :  { %v2761_v24 = vpop.f32.mrb[100].mxu1 }
 0x91b   :  { %v3726_v37 = vpop.f32.mrb[101].mxu1 }
 0x91c   :  { %v2764_v52 = vpop.f32.mrb[102].mxu1  ;;  %3735 = vmatpush3.bf16.msra.mxu0 %v3845_v38 }
 0x91d   :  { %v3727_v30 = vpop.f32.mrb[103].mxu1 }
 0x9e2   :  { %v2693_v45 = vpop.f32.mrb[100].mxu0 }
 0x9e3   :  { %v2762_v11 = vadd.f32 %v2761_v24, %v2693_v45  ;;  %v3714_v7 = vpop.f32.mrb[101].mxu0 }
 0x9e4   :  { %v2696_v13 = vpop.f32.mrb[102].mxu0 }
 0x9e5   :  { %v2775_v1 = vadd.f32 %v3097_v56, %v2762_v11  ;;  %v2765_v54 = vadd.f32 %v2764_v52, %v2696_v13  ;;  %v3715_v8 = vpop.f32.mrb[103].mxu0 }
 0x9e7   :  { %v2776_v55 = vadd.f32 %v3097_v56, %v2765_v54  ;;  %v2777_v4 = vmax.f32 %v2775_v1, 0.0 }
 0x9e9   :  { %v2778_v6 = vmax.f32 %v2776_v55, 0.0 }
 0x9eb   :  { %v2779_v27 = vpack.c.bf16 %v2778_v6, %v2777_v4 }
 0x9ed   :  { %3737 = vmatmul.mubr.msk.bf16.vlgmr.msra.gmra.mrb[104].mxu0 %vm352_vm1, %v2779_v27 }
 0xac0   :  { %v2856_v57 = vpop.f32.mrb[104].mxu0 }
 0xac1   :  { %v2857_v16 = vadd.f32 %v3098_v51, %v2856_v57  ;;  %v3738_v10 = vpop.f32.mrb[105].mxu0 }
 0xac2   :  { %v2859_v58 = vpop.f32.mrb[106].mxu0 }
 0xac3   :  { %v2860_v39 = vadd.f32 %v3098_v51, %v2859_v58  ;;  %v3739_v47 = vpop.f32.mrb[107].mxu0  ;;  %v2863_v46 = vmax.f32 %v2857_v16, 0.0 }
 0xac5   :  { %v2864_v49 = vmax.f32 %v2860_v39, 0.0 }
 0xac7   :  { %v2865_v2 = vpack.c.bf16 %v2864_v49, %v2863_v46 }
 0xac9   :  { %3749 = vmatmul.mubr.msk.bf16.vlgmr.msra.gmra.mrb[104].mxu1 %vm352_vm1, %v2865_v2 }
 0xb9c   :  { %v2942_v60 = vpop.f32.mrb[104].mxu1 }
 0xb9d   :  { %v2943_v34 = vadd.f32 %v3104_v12, %v2942_v60  ;;  %v3750_v5 = vpop.f32.mrb[105].mxu1 }
 0xb9e   :  { %v2945_v43 = vpop.f32.mrb[106].mxu1 }
 0xb9f   :  { %2949 = vst [vmem:[%s5308_s22] sm:$0xff] %v2943_v34  ;;  %v2946_v44 = vadd.f32 %v3104_v12, %v2945_v43  ;;  %v3751_v62 = vpop.f32.mrb[107].mxu1 }
 0xba1   :  { %2950 = vst [vmem:[%s5308_s22 + $0x8] sm:$0xff] %v2946_v44 }

</bundles_post_ra>
